<compile_context>
chip_gen: v7x
topology: tpu7x:2x2x1
jax: 0.10.0
libtpu: 0.0.40
codegen_flags: <defaults>
</compile_context>

<pallas_src>
import functools

import jax
import jax.numpy as jnp
from jax import lax
from jax.experimental import pallas as pl
from jax.experimental.pallas import tpu as pltpu

# Small-but-consistent hyperparameters (dim must be divisible by heads).
DIM = 128
HEADS = 4
HEAD_DIM = DIM // HEADS
MLP_DIM = 256
SEQ = 16
BATCH = 2
LN_EPS = 1e-5


def _layernorm(h, gamma, beta):
    mu = jnp.mean(h, axis=-1, keepdims=True)
    var = jnp.mean((h - mu) * (h - mu), axis=-1, keepdims=True)
    return (h - mu) * lax.rsqrt(var + LN_EPS) * gamma + beta


def _gelu_exact(x):
    # torch.gelu default: exact erf formulation.
    return 0.5 * x * (1.0 + lax.erf(x * 0.7071067811865475))


def transformer_block_kernel(
    x_ref,        # (B*S, D)     f32
    bias_ref,     # (B*S, B*S)   f32  block-diagonal batch-isolation bias (host-built)
    ln1g_ref,     # (1, D)       f32
    ln1b_ref,     # (1, D)       f32
    wqkv_ref,     # (D, 3D)      bf16 (Q slab pre-scaled by head_dim**-0.5)
    wproj_ref,    # (D, D)       bf16
    bproj_ref,    # (1, D)       f32
    ln2g_ref,     # (1, D)       f32
    ln2b_ref,     # (1, D)       f32
    w1_ref,       # (D, MLP)     bf16
    b1_ref,       # (1, MLP)     f32
    w2_ref,       # (MLP, D)     bf16
    b2_ref,       # (1, D)       f32
    o_ref,        # (B*S, D)
    ctx_ref,      # (B*S, D)     bf16 VMEM scratch: per-head contexts, lane-concatenated
    *,
    dim, heads, head_dim,
):
    f32, bf16 = jnp.float32, jnp.bfloat16

    x = x_ref[...].astype(f32)                                        # (N, D)
    bias = bias_ref[...]                                              # (N, N) f32

    # ---- Attention branch ----
    h = _layernorm(x, ln1g_ref[...], ln1b_ref[...])
    qkv = jnp.dot(h.astype(bf16), wqkv_ref[...],
                  preferred_element_type=f32)                         # (N, 3D) f32 acc
    # Cast to MXU operand dtype once (not per-head, not per-slice).
    q = qkv[:, 0 * dim:1 * dim].astype(bf16)
    k = qkv[:, 1 * dim:2 * dim].astype(bf16)
    v = qkv[:, 2 * dim:3 * dim].astype(bf16)

    for hh in range(heads):                 # static unroll over heads
        lo = hh * head_dim
        qh = q[:, lo:lo + head_dim]
        kh = k[:, lo:lo + head_dim]
        vh = v[:, lo:lo + head_dim]
        # Contract the last dim of BOTH operands: no explicit kh.T relayout.
        s = lax.dot_general(qh, kh,
                            dimension_numbers=(((1,), (1,)), ((), ())),
                            preferred_element_type=f32) + bias        # (N, N); Q pre-scaled
        s = s - jnp.max(s, axis=-1, keepdims=True)
        p = jnp.exp(s)
        p = p * pl.reciprocal(jnp.sum(p, axis=-1, keepdims=True), approx=True)
        ctx = jnp.dot(p.astype(bf16), vh, preferred_element_type=f32)  # (N, hd)
        ctx_ref[:, lo:lo + head_dim] = ctx.astype(bf16)

    # One fused K=128 output projection (replaces 4 K=32 matmuls + 4 f32 adds).
    attn_out = jnp.dot(ctx_ref[...], wproj_ref[...], preferred_element_type=f32)
    x = x + attn_out + bproj_ref[...]                                  # residual 1

    # ---- MLP branch ----
    h2 = _layernorm(x, ln2g_ref[...], ln2b_ref[...])
    h2 = jnp.dot(h2.astype(bf16), w1_ref[...], preferred_element_type=f32) + b1_ref[...]
    h2 = _gelu_exact(h2)
    # TODO(synk): dropout is identity here (inference / p effectively 0).
    h2 = jnp.dot(h2.astype(bf16), w2_ref[...], preferred_element_type=f32) + b2_ref[...]
    x = x + h2                                                         # residual 2

    o_ref[...] = x.astype(o_ref.dtype)


def make_block_bias(batch, seq):
    """Host-side compile-time-constant block-diagonal additive bias for folded batch."""
    n = batch * seq
    row_b = jnp.arange(n, dtype=jnp.int32)[:, None] // seq
    col_b = jnp.arange(n, dtype=jnp.int32)[None, :] // seq
    return jnp.where(row_b == col_b, 0.0, -1e30).astype(jnp.float32)


def prepare_params(params, *, heads=HEADS):
    """One-time parameter transform: pre-scale the Q slab, cast matmul weights to bf16."""
    D = params["wqkv"].shape[0]
    head_dim = D // heads
    scale = float(head_dim) ** (-0.5)
    wqkv = params["wqkv"].astype(jnp.float32)
    wqkv = wqkv.at[:, :D].multiply(scale)          # fold attention scale into W_q
    return {
        "ln1_g": params["ln1_g"].astype(jnp.float32),
        "ln1_b": params["ln1_b"].astype(jnp.float32),
        "wqkv": wqkv.astype(jnp.bfloat16),
        "wproj": params["wproj"].astype(jnp.bfloat16),
        "bproj": params["bproj"].astype(jnp.float32),
        "ln2_g": params["ln2_g"].astype(jnp.float32),
        "ln2_b": params["ln2_b"].astype(jnp.float32),
        "w1": params["w1"].astype(jnp.bfloat16),
        "b1": params["b1"].astype(jnp.float32),
        "w2": params["w2"].astype(jnp.bfloat16),
        "b2": params["b2"].astype(jnp.float32),
    }


def transformer_block(x, prepped, *, heads=HEADS):
    B, S, D = x.shape
    head_dim = D // heads
    x2d = x.reshape(B * S, D)          # lane-dense (B*S, 128) slab; batch folded into M
    bias = make_block_bias(B, S)       # (B*S, B*S) f32, 4 KB at these shapes

    kernel = functools.partial(
        transformer_block_kernel, dim=D, heads=heads, head_dim=head_dim)

    out2d = pl.pallas_call(
        kernel,
        out_shape=jax.ShapeDtypeStruct((B * S, D), x.dtype),
        # No grid: a single invocation processes the whole slab; every input is a
        # full-array VMEM block (weights ~0.2 MB bf16, trivially resident).
        scratch_shapes=[pltpu.VMEM((B * S, D), jnp.bfloat16)],   # per-head ctx slab
    )(
        x2d, bias,
        prepped["ln1_g"], prepped["ln1_b"],
        prepped["wqkv"], prepped["wproj"], prepped["bproj"],
        prepped["ln2_g"], prepped["ln2_b"],
        prepped["w1"], prepped["b1"], prepped["w2"], prepped["b2"],
    )
    return out2d.reshape(B, S, D)


def reference_block(x, params, *, heads=HEADS):
    """Pure-JAX f32 reference reproducing the PyTorch forward."""
    B, S, D = x.shape
    hd = D // heads

    def ln(h, g, b):
        mu = jnp.mean(h, axis=-1, keepdims=True)
        var = jnp.mean((h - mu) ** 2, axis=-1, keepdims=True)
        return (h - mu) / jnp.sqrt(var + LN_EPS) * g + b

    h = ln(x, params["ln1_g"], params["ln1_b"])
    qkv = h @ params["wqkv"]
    q, k, v = jnp.split(qkv, 3, axis=-1)
    q = q.reshape(B, S, heads, hd).transpose(0, 2, 1, 3)
    k = k.reshape(B, S, heads, hd).transpose(0, 2, 1, 3)
    v = v.reshape(B, S, heads, hd).transpose(0, 2, 1, 3)
    attn = jnp.einsum("bhqd,bhkd->bhqk", q, k) * (hd ** -0.5)
    attn = jax.nn.softmax(attn, axis=-1)
    out = jnp.einsum("bhqk,bhkd->bhqd", attn, v)
    out = out.transpose(0, 2, 1, 3).reshape(B, S, D)
    out = out @ params["wproj"] + params["bproj"]
    x = x + out

    h2 = ln(x, params["ln2_g"], params["ln2_b"])
    h2 = h2 @ params["w1"] + params["b1"]
    h2 = 0.5 * h2 * (1.0 + lax.erf(h2 * 0.7071067811865475))
    h2 = h2 @ params["w2"] + params["b2"]
    return x + h2


def init_params(key, dim=DIM, mlp_dim=MLP_DIM):
    ks = jax.random.split(key, 8)
    s = 0.02
    return {
        "ln1_g": jnp.ones((1, dim), jnp.float32),
        "ln1_b": jnp.zeros((1, dim), jnp.float32),
        "wqkv": (s * jax.random.normal(ks[0], (dim, 3 * dim))).astype(jnp.float32),
        "wproj": (s * jax.random.normal(ks[1], (dim, dim))).astype(jnp.float32),
        "bproj": (s * jax.random.normal(ks[2], (1, dim))).astype(jnp.float32),
        "ln2_g": jnp.ones((1, dim), jnp.float32),
        "ln2_b": jnp.zeros((1, dim), jnp.float32),
        "w1": (s * jax.random.normal(ks[3], (dim, mlp_dim))).astype(jnp.float32),
        "b1": (s * jax.random.normal(ks[4], (1, mlp_dim))).astype(jnp.float32),
        "w2": (s * jax.random.normal(ks[5], (mlp_dim, dim))).astype(jnp.float32),
        "b2": (s * jax.random.normal(ks[6], (1, dim))).astype(jnp.float32),
    }


if __name__ == "__main__":
    key = jax.random.PRNGKey(0)
    k_x, k_p = jax.random.split(key)
    x = jax.random.normal(k_x, (BATCH, SEQ, DIM), jnp.float32)
    params = init_params(k_p)
    prepped = prepare_params(params, heads=HEADS)

    out = transformer_block(x, prepped, heads=HEADS)
    out = jax.block_until_ready(out)

    ref = reference_block(x, params, heads=HEADS)
    assert out.shape == (BATCH, SEQ, DIM)
    max_err = float(jnp.max(jnp.abs(out - ref)))
    # bf16 matmul operands + approx reciprocal vs. an all-f32 reference -> loosen tol.
    assert jnp.allclose(out, ref, atol=2e-2, rtol=2e-2), max_err
    print("KERNEL_OK")
</pallas_src>

<mosaic_0001>
module attributes {stable_mosaic.version = 11 : i64} {
  func.func @transformer_block_kernel(%arg0: memref<32x128xf32, #tpu.memory_space<vmem>>, %arg1: memref<32x32xf32, #tpu.memory_space<vmem>>, %arg2: memref<1x128xf32, #tpu.memory_space<vmem>>, %arg3: memref<1x128xf32, #tpu.memory_space<vmem>>, %arg4: memref<128x384xbf16, #tpu.memory_space<vmem>>, %arg5: memref<128x128xbf16, #tpu.memory_space<vmem>>, %arg6: memref<1x128xf32, #tpu.memory_space<vmem>>, %arg7: memref<1x128xf32, #tpu.memory_space<vmem>>, %arg8: memref<1x128xf32, #tpu.memory_space<vmem>>, %arg9: memref<128x256xbf16, #tpu.memory_space<vmem>>, %arg10: memref<1x256xf32, #tpu.memory_space<vmem>>, %arg11: memref<256x128xbf16, #tpu.memory_space<vmem>>, %arg12: memref<1x128xf32, #tpu.memory_space<vmem>>, %arg13: memref<32x128xf32, #tpu.memory_space<vmem>>, %arg14: memref<32x128xbf16, #tpu.memory_space<vmem>>) attributes {dimension_semantics = [], scalar_prefetch = 0 : i64, scratch_operands = 1 : i64, tpu.core_type = #tpu.core_type<tc>} {
    %c0 = arith.constant 0 : index
    %c0_0 = arith.constant 0 : index
    %0 = vector.load %arg0[%c0, %c0_0] : memref<32x128xf32, #tpu.memory_space<vmem>>, vector<32x128xf32>
    %c0_1 = arith.constant 0 : index
    %c0_2 = arith.constant 0 : index
    %1 = vector.load %arg1[%c0_1, %c0_2] : memref<32x32xf32, #tpu.memory_space<vmem>>, vector<32x32xf32>
    %c0_3 = arith.constant 0 : index
    %c0_4 = arith.constant 0 : index
    %2 = vector.load %arg2[%c0_3, %c0_4] : memref<1x128xf32, #tpu.memory_space<vmem>>, vector<1x128xf32>
    %c0_5 = arith.constant 0 : index
    %c0_6 = arith.constant 0 : index
    %3 = vector.load %arg3[%c0_5, %c0_6] : memref<1x128xf32, #tpu.memory_space<vmem>>, vector<1x128xf32>
    %cst = arith.constant dense<0.000000e+00> : vector<32xf32>
    %4 = vector.multi_reduction <add>, %0, %cst [1] : vector<32x128xf32> to vector<32xf32>
    %5 = vector.shape_cast %4 : vector<32xf32> to vector<32x1xf32>
    %cst_7 = arith.constant 1.280000e+02 : f32
    %6 = vector.broadcast %cst_7 : f32 to vector<32x1xf32>
    %7 = arith.divf %5, %6 : vector<32x1xf32>
    %8 = vector.broadcast %7 : vector<32x1xf32> to vector<32x128xf32>
    %9 = arith.subf %0, %8 : vector<32x128xf32>
    %10 = vector.broadcast %7 : vector<32x1xf32> to vector<32x128xf32>
    %11 = arith.subf %0, %10 : vector<32x128xf32>
    %12 = arith.mulf %9, %11 : vector<32x128xf32>
    %cst_8 = arith.constant dense<0.000000e+00> : vector<32xf32>
    %13 = vector.multi_reduction <add>, %12, %cst_8 [1] : vector<32x128xf32> to vector<32xf32>
    %14 = vector.shape_cast %13 : vector<32xf32> to vector<32x1xf32>
    %cst_9 = arith.constant 1.280000e+02 : f32
    %15 = vector.broadcast %cst_9 : f32 to vector<32x1xf32>
    %16 = arith.divf %14, %15 : vector<32x1xf32>
    %17 = vector.broadcast %7 : vector<32x1xf32> to vector<32x128xf32>
    %18 = arith.subf %0, %17 : vector<32x128xf32>
    %cst_10 = arith.constant 9.99999974E-6 : f32
    %19 = vector.broadcast %cst_10 : f32 to vector<32x1xf32>
    %20 = arith.addf %16, %19 : vector<32x1xf32>
    %21 = math.rsqrt %20 : vector<32x1xf32>
    %22 = vector.broadcast %21 : vector<32x1xf32> to vector<32x128xf32>
    %23 = arith.mulf %18, %22 : vector<32x128xf32>
    %24 = vector.broadcast %2 : vector<1x128xf32> to vector<32x128xf32>
    %25 = arith.mulf %23, %24 : vector<32x128xf32>
    %26 = vector.broadcast %3 : vector<1x128xf32> to vector<32x128xf32>
    %27 = arith.addf %25, %26 : vector<32x128xf32>
    %28 = arith.truncf %27 : vector<32x128xf32> to vector<32x128xbf16>
    %c0_11 = arith.constant 0 : index
    %c0_12 = arith.constant 0 : index
    %29 = vector.load %arg4[%c0_11, %c0_12] : memref<128x384xbf16, #tpu.memory_space<vmem>>, vector<128x384xbf16>
    %cst_13 = arith.constant dense<0.000000e+00> : vector<32x384xf32>
    %30 = tpu.matmul %28, %29, %cst_13 {dimension_numbers = #tpu.dot_dimension_numbers<[1], [0], [0], [1], [0, 0, 1, 1], [], []>} : vector<32x128xbf16>, vector<128x384xbf16>, vector<32x384xf32> -> vector<32x384xf32>
    %31 = vector.extract_strided_slice %30 {offsets = [0, 0], sizes = [32, 128], strides = [1, 1]} : vector<32x384xf32> to vector<32x128xf32>
    %32 = arith.truncf %31 : vector<32x128xf32> to vector<32x128xbf16>
    %33 = vector.extract_strided_slice %30 {offsets = [0, 128], sizes = [32, 128], strides = [1, 1]} : vector<32x384xf32> to vector<32x128xf32>
    %34 = arith.truncf %33 : vector<32x128xf32> to vector<32x128xbf16>
    %35 = vector.extract_strided_slice %30 {offsets = [0, 256], sizes = [32, 128], strides = [1, 1]} : vector<32x384xf32> to vector<32x128xf32>
    %36 = arith.truncf %35 : vector<32x128xf32> to vector<32x128xbf16>
    %37 = vector.extract_strided_slice %32 {offsets = [0, 0], sizes = [32, 32], strides = [1, 1]} : vector<32x128xbf16> to vector<32x32xbf16>
    %38 = vector.extract_strided_slice %34 {offsets = [0, 0], sizes = [32, 32], strides = [1, 1]} : vector<32x128xbf16> to vector<32x32xbf16>
    %39 = vector.extract_strided_slice %36 {offsets = [0, 0], sizes = [32, 32], strides = [1, 1]} : vector<32x128xbf16> to vector<32x32xbf16>
    %cst_14 = arith.constant dense<0.000000e+00> : vector<32x32xf32>
    %40 = tpu.matmul %37, %38, %cst_14 {dimension_numbers = #tpu.dot_dimension_numbers<[1], [1], [0], [0], [0, 0, 1, 0], [], []>} : vector<32x32xbf16>, vector<32x32xbf16>, vector<32x32xf32> -> vector<32x32xf32>
    %41 = arith.addf %40, %1 : vector<32x32xf32>
    %cst_15 = arith.constant dense<0xFF800000> : vector<32xf32>
    %42 = vector.multi_reduction <maximumf>, %41, %cst_15 [1] : vector<32x32xf32> to vector<32xf32>
    %43 = vector.shape_cast %42 : vector<32xf32> to vector<32x1xf32>
    %44 = vector.broadcast %43 : vector<32x1xf32> to vector<32x32xf32>
    %45 = arith.subf %41, %44 : vector<32x32xf32>
    %46 = math.exp %45 : vector<32x32xf32>
    %cst_16 = arith.constant dense<0.000000e+00> : vector<32xf32>
    %47 = vector.multi_reduction <add>, %46, %cst_16 [1] : vector<32x32xf32> to vector<32xf32>
    %48 = vector.shape_cast %47 : vector<32xf32> to vector<32x1xf32>
    %49 = tpu.reciprocal %48 {approx = true} : vector<32x1xf32> -> vector<32x1xf32>
    %50 = vector.broadcast %49 : vector<32x1xf32> to vector<32x32xf32>
    %51 = arith.mulf %46, %50 : vector<32x32xf32>
    %52 = arith.truncf %51 : vector<32x32xf32> to vector<32x32xbf16>
    %cst_17 = arith.constant dense<0.000000e+00> : vector<32x32xf32>
    %53 = tpu.matmul %52, %39, %cst_17 {dimension_numbers = #tpu.dot_dimension_numbers<[1], [0], [0], [1], [0, 0, 1, 1], [], []>} : vector<32x32xbf16>, vector<32x32xbf16>, vector<32x32xf32> -> vector<32x32xf32>
    %54 = arith.truncf %53 : vector<32x32xf32> to vector<32x32xbf16>
    %c0_18 = arith.constant 0 : index
    %c0_19 = arith.constant 0 : index
    %55 = vector.load %arg14[%c0_18, %c0_19] : memref<32x128xbf16, #tpu.memory_space<vmem>>, vector<32x32xbf16>
    tpu.vector_store %arg14[%c0_18, %c0_19], %54 {strides = array<i32>} : memref<32x128xbf16, #tpu.memory_space<vmem>>, vector<32x32xbf16>,
    %56 = vector.extract_strided_slice %32 {offsets = [0, 32], sizes = [32, 32], strides = [1, 1]} : vector<32x128xbf16> to vector<32x32xbf16>
    %57 = vector.extract_strided_slice %34 {offsets = [0, 32], sizes = [32, 32], strides = [1, 1]} : vector<32x128xbf16> to vector<32x32xbf16>
    %58 = vector.extract_strided_slice %36 {offsets = [0, 32], sizes = [32, 32], strides = [1, 1]} : vector<32x128xbf16> to vector<32x32xbf16>
    %cst_20 = arith.constant dense<0.000000e+00> : vector<32x32xf32>
    %59 = tpu.matmul %56, %57, %cst_20 {dimension_numbers = #tpu.dot_dimension_numbers<[1], [1], [0], [0], [0, 0, 1, 0], [], []>} : vector<32x32xbf16>, vector<32x32xbf16>, vector<32x32xf32> -> vector<32x32xf32>
    %60 = arith.addf %59, %1 : vector<32x32xf32>
    %cst_21 = arith.constant dense<0xFF800000> : vector<32xf32>
    %61 = vector.multi_reduction <maximumf>, %60, %cst_21 [1] : vector<32x32xf32> to vector<32xf32>
    %62 = vector.shape_cast %61 : vector<32xf32> to vector<32x1xf32>
    %63 = vector.broadcast %62 : vector<32x1xf32> to vector<32x32xf32>
    %64 = arith.subf %60, %63 : vector<32x32xf32>
    %65 = math.exp %64 : vector<32x32xf32>
    %cst_22 = arith.constant dense<0.000000e+00> : vector<32xf32>
    %66 = vector.multi_reduction <add>, %65, %cst_22 [1] : vector<32x32xf32> to vector<32xf32>
    %67 = vector.shape_cast %66 : vector<32xf32> to vector<32x1xf32>
    %68 = tpu.reciprocal %67 {approx = true} : vector<32x1xf32> -> vector<32x1xf32>
    %69 = vector.broadcast %68 : vector<32x1xf32> to vector<32x32xf32>
    %70 = arith.mulf %65, %69 : vector<32x32xf32>
    %71 = arith.truncf %70 : vector<32x32xf32> to vector<32x32xbf16>
    %cst_23 = arith.constant dense<0.000000e+00> : vector<32x32xf32>
    %72 = tpu.matmul %71, %58, %cst_23 {dimension_numbers = #tpu.dot_dimension_numbers<[1], [0], [0], [1], [0, 0, 1, 1], [], []>} : vector<32x32xbf16>, vector<32x32xbf16>, vector<32x32xf32> -> vector<32x32xf32>
    %73 = arith.truncf %72 : vector<32x32xf32> to vector<32x32xbf16>
    %c0_24 = arith.constant 0 : index
    %c32 = arith.constant 32 : index
    %74 = vector.load %arg14[%c0_24, %c32] : memref<32x128xbf16, #tpu.memory_space<vmem>>, vector<32x32xbf16>
    tpu.vector_store %arg14[%c0_24, %c32], %73 {strides = array<i32>} : memref<32x128xbf16, #tpu.memory_space<vmem>>, vector<32x32xbf16>,
    %75 = vector.extract_strided_slice %32 {offsets = [0, 64], sizes = [32, 32], strides = [1, 1]} : vector<32x128xbf16> to vector<32x32xbf16>
    %76 = vector.extract_strided_slice %34 {offsets = [0, 64], sizes = [32, 32], strides = [1, 1]} : vector<32x128xbf16> to vector<32x32xbf16>
    %77 = vector.extract_strided_slice %36 {offsets = [0, 64], sizes = [32, 32], strides = [1, 1]} : vector<32x128xbf16> to vector<32x32xbf16>
    %cst_25 = arith.constant dense<0.000000e+00> : vector<32x32xf32>
    %78 = tpu.matmul %75, %76, %cst_25 {dimension_numbers = #tpu.dot_dimension_numbers<[1], [1], [0], [0], [0, 0, 1, 0], [], []>} : vector<32x32xbf16>, vector<32x32xbf16>, vector<32x32xf32> -> vector<32x32xf32>
    %79 = arith.addf %78, %1 : vector<32x32xf32>
    %cst_26 = arith.constant dense<0xFF800000> : vector<32xf32>
    %80 = vector.multi_reduction <maximumf>, %79, %cst_26 [1] : vector<32x32xf32> to vector<32xf32>
    %81 = vector.shape_cast %80 : vector<32xf32> to vector<32x1xf32>
    %82 = vector.broadcast %81 : vector<32x1xf32> to vector<32x32xf32>
    %83 = arith.subf %79, %82 : vector<32x32xf32>
    %84 = math.exp %83 : vector<32x32xf32>
    %cst_27 = arith.constant dense<0.000000e+00> : vector<32xf32>
    %85 = vector.multi_reduction <add>, %84, %cst_27 [1] : vector<32x32xf32> to vector<32xf32>
    %86 = vector.shape_cast %85 : vector<32xf32> to vector<32x1xf32>
    %87 = tpu.reciprocal %86 {approx = true} : vector<32x1xf32> -> vector<32x1xf32>
    %88 = vector.broadcast %87 : vector<32x1xf32> to vector<32x32xf32>
    %89 = arith.mulf %84, %88 : vector<32x32xf32>
    %90 = arith.truncf %89 : vector<32x32xf32> to vector<32x32xbf16>
    %cst_28 = arith.constant dense<0.000000e+00> : vector<32x32xf32>
    %91 = tpu.matmul %90, %77, %cst_28 {dimension_numbers = #tpu.dot_dimension_numbers<[1], [0], [0], [1], [0, 0, 1, 1], [], []>} : vector<32x32xbf16>, vector<32x32xbf16>, vector<32x32xf32> -> vector<32x32xf32>
    %92 = arith.truncf %91 : vector<32x32xf32> to vector<32x32xbf16>
    %c0_29 = arith.constant 0 : index
    %c64 = arith.constant 64 : index
    %93 = vector.load %arg14[%c0_29, %c64] : memref<32x128xbf16, #tpu.memory_space<vmem>>, vector<32x32xbf16>
    tpu.vector_store %arg14[%c0_29, %c64], %92 {strides = array<i32>} : memref<32x128xbf16, #tpu.memory_space<vmem>>, vector<32x32xbf16>,
    %94 = vector.extract_strided_slice %32 {offsets = [0, 96], sizes = [32, 32], strides = [1, 1]} : vector<32x128xbf16> to vector<32x32xbf16>
    %95 = vector.extract_strided_slice %34 {offsets = [0, 96], sizes = [32, 32], strides = [1, 1]} : vector<32x128xbf16> to vector<32x32xbf16>
    %96 = vector.extract_strided_slice %36 {offsets = [0, 96], sizes = [32, 32], strides = [1, 1]} : vector<32x128xbf16> to vector<32x32xbf16>
    %cst_30 = arith.constant dense<0.000000e+00> : vector<32x32xf32>
    %97 = tpu.matmul %94, %95, %cst_30 {dimension_numbers = #tpu.dot_dimension_numbers<[1], [1], [0], [0], [0, 0, 1, 0], [], []>} : vector<32x32xbf16>, vector<32x32xbf16>, vector<32x32xf32> -> vector<32x32xf32>
    %98 = arith.addf %97, %1 : vector<32x32xf32>
    %cst_31 = arith.constant dense<0xFF800000> : vector<32xf32>
    %99 = vector.multi_reduction <maximumf>, %98, %cst_31 [1] : vector<32x32xf32> to vector<32xf32>
    %100 = vector.shape_cast %99 : vector<32xf32> to vector<32x1xf32>
    %101 = vector.broadcast %100 : vector<32x1xf32> to vector<32x32xf32>
    %102 = arith.subf %98, %101 : vector<32x32xf32>
    %103 = math.exp %102 : vector<32x32xf32>
    %cst_32 = arith.constant dense<0.000000e+00> : vector<32xf32>
    %104 = vector.multi_reduction <add>, %103, %cst_32 [1] : vector<32x32xf32> to vector<32xf32>
    %105 = vector.shape_cast %104 : vector<32xf32> to vector<32x1xf32>
    %106 = tpu.reciprocal %105 {approx = true} : vector<32x1xf32> -> vector<32x1xf32>
    %107 = vector.broadcast %106 : vector<32x1xf32> to vector<32x32xf32>
    %108 = arith.mulf %103, %107 : vector<32x32xf32>
    %109 = arith.truncf %108 : vector<32x32xf32> to vector<32x32xbf16>
    %cst_33 = arith.constant dense<0.000000e+00> : vector<32x32xf32>
    %110 = tpu.matmul %109, %96, %cst_33 {dimension_numbers = #tpu.dot_dimension_numbers<[1], [0], [0], [1], [0, 0, 1, 1], [], []>} : vector<32x32xbf16>, vector<32x32xbf16>, vector<32x32xf32> -> vector<32x32xf32>
    %111 = arith.truncf %110 : vector<32x32xf32> to vector<32x32xbf16>
    %c0_34 = arith.constant 0 : index
    %c96 = arith.constant 96 : index
    %112 = vector.load %arg14[%c0_34, %c96] : memref<32x128xbf16, #tpu.memory_space<vmem>>, vector<32x32xbf16>
    tpu.vector_store %arg14[%c0_34, %c96], %111 {strides = array<i32>} : memref<32x128xbf16, #tpu.memory_space<vmem>>, vector<32x32xbf16>,
    %c0_35 = arith.constant 0 : index
    %c0_36 = arith.constant 0 : index
    %113 = vector.load %arg14[%c0_35, %c0_36] : memref<32x128xbf16, #tpu.memory_space<vmem>>, vector<32x128xbf16>
    %c0_37 = arith.constant 0 : index
    %c0_38 = arith.constant 0 : index
    %114 = vector.load %arg5[%c0_37, %c0_38] : memref<128x128xbf16, #tpu.memory_space<vmem>>, vector<128x128xbf16>
    %cst_39 = arith.constant dense<0.000000e+00> : vector<32x128xf32>
    %115 = tpu.matmul %113, %114, %cst_39 {dimension_numbers = #tpu.dot_dimension_numbers<[1], [0], [0], [1], [0, 0, 1, 1], [], []>} : vector<32x128xbf16>, vector<128x128xbf16>, vector<32x128xf32> -> vector<32x128xf32>
    %116 = arith.addf %0, %115 : vector<32x128xf32>
    %c0_40 = arith.constant 0 : index
    %c0_41 = arith.constant 0 : index
    %117 = vector.load %arg6[%c0_40, %c0_41] : memref<1x128xf32, #tpu.memory_space<vmem>>, vector<1x128xf32>
    %118 = vector.broadcast %117 : vector<1x128xf32> to vector<32x128xf32>
    %119 = arith.addf %116, %118 : vector<32x128xf32>
    %c0_42 = arith.constant 0 : index
    %c0_43 = arith.constant 0 : index
    %120 = vector.load %arg7[%c0_42, %c0_43] : memref<1x128xf32, #tpu.memory_space<vmem>>, vector<1x128xf32>
    %c0_44 = arith.constant 0 : index
    %c0_45 = arith.constant 0 : index
    %121 = vector.load %arg8[%c0_44, %c0_45] : memref<1x128xf32, #tpu.memory_space<vmem>>, vector<1x128xf32>
    %cst_46 = arith.constant dense<0.000000e+00> : vector<32xf32>
    %122 = vector.multi_reduction <add>, %119, %cst_46 [1] : vector<32x128xf32> to vector<32xf32>
    %123 = vector.shape_cast %122 : vector<32xf32> to vector<32x1xf32>
    %cst_47 = arith.constant 1.280000e+02 : f32
    %124 = vector.broadcast %cst_47 : f32 to vector<32x1xf32>
    %125 = arith.divf %123, %124 : vector<32x1xf32>
    %126 = vector.broadcast %125 : vector<32x1xf32> to vector<32x128xf32>
    %127 = arith.subf %119, %126 : vector<32x128xf32>
    %128 = vector.broadcast %125 : vector<32x1xf32> to vector<32x128xf32>
    %129 = arith.subf %119, %128 : vector<32x128xf32>
    %130 = arith.mulf %127, %129 : vector<32x128xf32>
    %cst_48 = arith.constant dense<0.000000e+00> : vector<32xf32>
    %131 = vector.multi_reduction <add>, %130, %cst_48 [1] : vector<32x128xf32> to vector<32xf32>
    %132 = vector.shape_cast %131 : vector<32xf32> to vector<32x1xf32>
    %cst_49 = arith.constant 1.280000e+02 : f32
    %133 = vector.broadcast %cst_49 : f32 to vector<32x1xf32>
    %134 = arith.divf %132, %133 : vector<32x1xf32>
    %135 = vector.broadcast %125 : vector<32x1xf32> to vector<32x128xf32>
    %136 = arith.subf %119, %135 : vector<32x128xf32>
    %cst_50 = arith.constant 9.99999974E-6 : f32
    %137 = vector.broadcast %cst_50 : f32 to vector<32x1xf32>
    %138 = arith.addf %134, %137 : vector<32x1xf32>
    %139 = math.rsqrt %138 : vector<32x1xf32>
    %140 = vector.broadcast %139 : vector<32x1xf32> to vector<32x128xf32>
    %141 = arith.mulf %136, %140 : vector<32x128xf32>
    %142 = vector.broadcast %120 : vector<1x128xf32> to vector<32x128xf32>
    %143 = arith.mulf %141, %142 : vector<32x128xf32>
    %144 = vector.broadcast %121 : vector<1x128xf32> to vector<32x128xf32>
    %145 = arith.addf %143, %144 : vector<32x128xf32>
    %146 = arith.truncf %145 : vector<32x128xf32> to vector<32x128xbf16>
    %c0_51 = arith.constant 0 : index
    %c0_52 = arith.constant 0 : index
    %147 = vector.load %arg9[%c0_51, %c0_52] : memref<128x256xbf16, #tpu.memory_space<vmem>>, vector<128x256xbf16>
    %cst_53 = arith.constant dense<0.000000e+00> : vector<32x256xf32>
    %148 = tpu.matmul %146, %147, %cst_53 {dimension_numbers = #tpu.dot_dimension_numbers<[1], [0], [0], [1], [0, 0, 1, 1], [], []>} : vector<32x128xbf16>, vector<128x256xbf16>, vector<32x256xf32> -> vector<32x256xf32>
    %c0_54 = arith.constant 0 : index
    %c0_55 = arith.constant 0 : index
    %149 = vector.load %arg10[%c0_54, %c0_55] : memref<1x256xf32, #tpu.memory_space<vmem>>, vector<1x256xf32>
    %150 = vector.broadcast %149 : vector<1x256xf32> to vector<32x256xf32>
    %151 = arith.addf %148, %150 : vector<32x256xf32>
    %cst_56 = arith.constant 5.000000e-01 : f32
    %152 = vector.broadcast %cst_56 : f32 to vector<32x256xf32>
    %153 = arith.mulf %152, %151 : vector<32x256xf32>
    %cst_57 = arith.constant 0.707106769 : f32
    %154 = vector.broadcast %cst_57 : f32 to vector<32x256xf32>
    %155 = arith.mulf %151, %154 : vector<32x256xf32>
    %156 = math.erf %155 : vector<32x256xf32>
    %cst_58 = arith.constant 1.000000e+00 : f32
    %157 = vector.broadcast %cst_58 : f32 to vector<32x256xf32>
    %158 = arith.addf %157, %156 : vector<32x256xf32>
    %159 = arith.mulf %153, %158 : vector<32x256xf32>
    %160 = arith.truncf %159 : vector<32x256xf32> to vector<32x256xbf16>
    %c0_59 = arith.constant 0 : index
    %c0_60 = arith.constant 0 : index
    %161 = vector.load %arg11[%c0_59, %c0_60] : memref<256x128xbf16, #tpu.memory_space<vmem>>, vector<256x128xbf16>
    %cst_61 = arith.constant dense<0.000000e+00> : vector<32x128xf32>
    %162 = tpu.matmul %160, %161, %cst_61 {dimension_numbers = #tpu.dot_dimension_numbers<[1], [0], [0], [1], [0, 0, 1, 1], [], []>} : vector<32x256xbf16>, vector<256x128xbf16>, vector<32x128xf32> -> vector<32x128xf32>
    %c0_62 = arith.constant 0 : index
    %c0_63 = arith.constant 0 : index
    %163 = vector.load %arg12[%c0_62, %c0_63] : memref<1x128xf32, #tpu.memory_space<vmem>>, vector<1x128xf32>
    %164 = vector.broadcast %163 : vector<1x128xf32> to vector<32x128xf32>
    %165 = arith.addf %162, %164 : vector<32x128xf32>
    %166 = arith.addf %119, %165 : vector<32x128xf32>
    %c0_64 = arith.constant 0 : index
    %c0_65 = arith.constant 0 : index
    %167 = vector.load %arg13[%c0_64, %c0_65] : memref<32x128xf32, #tpu.memory_space<vmem>>, vector<32x128xf32>
    tpu.vector_store %arg13[%c0_64, %c0_65], %166 {strides = array<i32>} : memref<32x128xf32, #tpu.memory_space<vmem>>, vector<32x128xf32>,
    return
  }
}

</mosaic_0001>

<bundles_post_ra>
// kernel: tpu_custom_call.1
= control target key start
LH: loop header
LB: loop body
LE: loop exit
PB: predicated region body
PF: predicated region fallthrough
CT: control target
= control target key end

     0   :  { %18 = vsyncpa [#allocation4], 0  ;;  %s2952_s0 = inlined_call_operand.hbm [shape: f32[32,128], index: 0, kind: input, shape index: {}]   ;;  %s2953_s1 = inlined_call_operand.hbm [shape: f32[32,32], index: 1, kind: input, shape index: {}]   ;;  %s2954_s2 = inlined_call_operand.vmem [shape: f32[1,128], index: 2, kind: input, shape index: {}]   ;;  %s2955_s3 = inlined_call_operand.vmem [shape: f32[1,128], index: 3, kind: input, shape index: {}]   ;;  %s2956_s4 = inlined_call_operand.hbm [shape: bf16[128,384], index: 4, kind: input, shape index: {}]   ;;  %s2957_s5 = inlined_call_operand.hbm [shape: bf16[128,128], index: 5, kind: input, shape index: {}]   ;;  %s2958_s6 = inlined_call_operand.vmem [shape: f32[1,128], index: 6, kind: input, shape index: {}]   ;;  %s2959_s7 = inlined_call_operand.vmem [shape: f32[1,128], index: 7, kind: input, shape index: {}]   ;;  %s2960_s8 = inlined_call_operand.vmem [shape: f32[1,128], index: 8, kind: input, shape index: {}]   ;;  %s2961_s9 = inlined_call_operand.hbm [shape: bf16[128,256], index: 9, kind: input, shape index: {}]   ;;  %s2962_s10 = inlined_call_operand.vmem [shape: f32[1,256], index: 10, kind: input, shape index: {}]   ;;  %s2963_s11 = inlined_call_operand.hbm [shape: bf16[256,128], index: 11, kind: input, shape index: {}]   ;;  %s2964_s12 = inlined_call_operand.vmem [shape: f32[1,128], index: 12, kind: input, shape index: {}]   ;;  %s2965_s13 = inlined_call_operand.hbm [shape: f32[32,128], index: 13, kind: output, shape index: {}]  }
   0x1   :  { %19 = vsyncpa [#allocation7], 0 }
   0x2   :  { %20 = vsyncpa [#allocation10], 0 }
   0x3   :  { %21 = vsyncpa [#allocation13], 0 }
   0x4   :  { %22 = vsyncpa [#allocation5], 0  ;;  %s2466_s25 = smov [#allocation6]   ;;  %s2467_s27 = smov [#allocation9]  }
   0x5   :  { %s40_s26 = sshll.u32 %s2466_s25, 4  ;;  %s68_s28 = sshll.u32 %s2467_s27, 4  ;;  %s41_s26 = int_to_ptr.vmem [resolvable:$true] %s40_s26  ;;  %s2552_s28 = int_to_ptr.vmem [resolvable:$true] %s68_s28 }
   0x6   :  { %s2302_s14 = scalar_lea.hbm %s2953_s1, 512 }
   0x7   :  { %p2303_p0 = scmp.ne.s32.totalorder %s2953_s1, %s2302_s14  ;;  %p2306_p1 = scmp.lt.u32.totalorder %s2302_s14, %s2953_s1 }
   0x9   :  { %p2308_p2 = pnand %p2306_p1, %p2303_p0 }
   0xb   :  { %2311 = shalt.err (!%p2308_p2)
}
   0xc   :  { %s2312_s19 = scalar_lea.vmem %s41_s26, 512  ;;  %p2317_p4 = scmp.lt.s32.totalorder %s41_s26, %s41_s26 }
   0xd   :  { %p2313_p3 = scmp.ne.s32.totalorder %s41_s26, %s2312_s19  ;;  %p2318_p5 = scmp.lt.s32.totalorder %s2312_s19, %s2312_s19 }
   0xf   :  { %p2319_p6 = por %p2318_p5, %p2317_p4 }
  0x11   :  { %p2320_p7 = pnand %p2319_p6, %p2313_p3 }
  0x13   :  { %2323 = shalt.err (!%p2320_p7)
}
  0x14   :  { %s2468_s20 = smov 128   ;;  %s2469_s21 = smov 8  }
  0x15   :  { %46 = dma.hbm_to_vmem [thread:$0]  %s2953_s1, 512, %s41_s26, [#allocation7], %s2468_s20, %s2468_s20, %s2469_s21  }
  0x16   :  { %s2324_s27 = scalar_lea.hbm %s2957_s5, 1024 }
  0x17   :  { %p2325_p8 = scmp.ne.s32.totalorder %s2957_s5, %s2324_s27  ;;  %p2328_p9 = scmp.lt.u32.totalorder %s2324_s27, %s2957_s5 }
  0x19   :  { %p2330_p10 = pnand %p2328_p9, %p2325_p8 }
  0x1b   :  { %2333 = shalt.err (!%p2330_p10)
}
  0x1c   :  { %s2334_s16 = scalar_lea.vmem %s2552_s28, 1024  ;;  %p2339_p12 = scmp.lt.s32.totalorder %s2552_s28, %s2552_s28 }
  0x1d   :  { %p2335_p11 = scmp.ne.s32.totalorder %s2552_s28, %s2334_s16  ;;  %p2340_p13 = scmp.lt.s32.totalorder %s2334_s16, %s2334_s16 }
  0x1f   :  { %p2341_p0 = por %p2340_p13, %p2339_p12 }
  0x21   :  { %p2342_p1 = pnand %p2341_p0, %p2335_p11 }
  0x23   :  { %2345 = shalt.err (!%p2342_p1)
}
  0x24   :  { %s2470_s1 = smov 64   ;;  %s2471_s26 = smov 4  }
  0x25   :  { %74 = dma.hbm_to_vmem [thread:$0]  %s2957_s5, 1024, %s2552_s28, [#allocation10], %s2470_s1, %s2470_s1, %s2471_s26  }
  0x26   :  { %s2472_s19 = smov [#allocation3]   ;;  %s2473_s23 = smov [#allocation8]  }
  0x27   :  { %s28_s22 = sshll.u32 %s2472_s19, 4  ;;  %s56_s24 = sshll.u32 %s2473_s23, 4  ;;  %s29_s22 = int_to_ptr.vmem [resolvable:$true] %s28_s22  ;;  %s2589_s24 = int_to_ptr.vmem [resolvable:$true] %s56_s24 }
  0x28   :  { %s2346_s29 = scalar_lea.hbm %s2952_s0, 512 }
  0x29   :  { %p2347_p2 = scmp.ne.s32.totalorder %s2952_s0, %s2346_s29  ;;  %p2350_p3 = scmp.lt.u32.totalorder %s2346_s29, %s2952_s0 }
  0x2b   :  { %p2352_p4 = pnand %p2350_p3, %p2347_p2 }
  0x2d   :  { %2355 = shalt.err (!%p2352_p4)
}
  0x2e   :  { %s2356_s5 = scalar_lea.vmem %s29_s22, 512  ;;  %p2361_p6 = scmp.lt.s32.totalorder %s29_s22, %s29_s22 }
  0x2f   :  { %p2357_p5 = scmp.ne.s32.totalorder %s29_s22, %s2356_s5  ;;  %p2362_p7 = scmp.lt.s32.totalorder %s2356_s5, %s2356_s5 }
  0x31   :  { %p2363_p8 = por %p2362_p7, %p2361_p6 }
  0x33   :  { %p2364_p9 = pnand %p2363_p8, %p2357_p5 }
  0x35   :  { %2367 = shalt.err (!%p2364_p9)
}
  0x36   :  { %34 = dma.hbm_to_vmem [thread:$0]  %s2952_s0, 512, %s29_s22, [#allocation4], %s2468_s20, %s2468_s20, %s2469_s21  }
  0x37   :  { %s2368_s23 = scalar_lea.hbm %s2956_s4, 3072 }
  0x38   :  { %p2369_p10 = scmp.ne.s32.totalorder %s2956_s4, %s2368_s23  ;;  %p2372_p11 = scmp.lt.u32.totalorder %s2368_s23, %s2956_s4 }
  0x3a   :  { %p2374_p12 = pnand %p2372_p11, %p2369_p10 }
  0x3c   :  { %2377 = shalt.err (!%p2374_p12)
}
  0x3d   :  { %s2378_s14 = scalar_lea.vmem %s2589_s24, 3072  ;;  %p2383_p0 = scmp.lt.s32.totalorder %s2589_s24, %s2589_s24 }
  0x3e   :  { %p2379_p13 = scmp.ne.s32.totalorder %s2589_s24, %s2378_s14  ;;  %p2384_p1 = scmp.lt.s32.totalorder %s2378_s14, %s2378_s14 }
  0x40   :  { %p2385_p2 = por %p2384_p1, %p2383_p0 }
  0x42   :  { %p2386_p3 = pnand %p2385_p2, %p2379_p13 }
  0x44   :  { %2389 = shalt.err (!%p2386_p3)
}
  0x45   :  { %s2474_s0 = smov 192   ;;  %s2475_s22 = smov 12  }
  0x46   :  { %62 = dma.hbm_to_vmem [thread:$0]  %s2956_s4, 3072, %s2589_s24, [#allocation7], %s2474_s0, %s2474_s0, %s2475_s22  }
  0x47   :  { %s2476_s5 = smov [#allocation11]   ;;  %s2477_s17 = smov [#allocation12]  }
  0x48   :  { %s86_s28 = sshll.u32 %s2476_s5, 4  ;;  %s100_s18 = sshll.u32 %s2477_s17, 4  ;;  %s87_s28 = int_to_ptr.vmem [resolvable:$true] %s86_s28  ;;  %s2623_s18 = int_to_ptr.vmem [resolvable:$true] %s100_s18 }
  0x49   :  { %s2390_s25 = scalar_lea.hbm %s2961_s9, 2048 }
  0x4a   :  { %p2391_p4 = scmp.ne.s32.totalorder %s2961_s9, %s2390_s25  ;;  %p2394_p5 = scmp.lt.u32.totalorder %s2390_s25, %s2961_s9 }
  0x4c   :  { %p2396_p6 = pnand %p2394_p5, %p2391_p4 }
  0x4e   :  { %2399 = shalt.err (!%p2396_p6)
}
  0x4f   :  { %s2400_s4 = scalar_lea.vmem %s87_s28, 2048  ;;  %p2405_p8 = scmp.lt.s32.totalorder %s87_s28, %s87_s28 }
  0x50   :  { %p2401_p7 = scmp.ne.s32.totalorder %s87_s28, %s2400_s4  ;;  %p2406_p9 = scmp.lt.s32.totalorder %s2400_s4, %s2400_s4 }
  0x52   :  { %p2407_p10 = por %p2406_p9, %p2405_p8 }
  0x54   :  { %p2408_p11 = pnand %p2407_p10, %p2401_p7 }
  0x56   :  { %2411 = shalt.err (!%p2408_p11)
}
  0x57   :  { %92 = dma.hbm_to_vmem [thread:$0]  %s2961_s9, 2048, %s87_s28, [#allocation10], %s2468_s20, %s2468_s20, %s2469_s21  }
  0x58   :  { %s2412_s16 = scalar_lea.hbm %s2963_s11, 2048 }
  0x59   :  { %p2413_p12 = scmp.ne.s32.totalorder %s2963_s11, %s2412_s16  ;;  %p2416_p13 = scmp.lt.u32.totalorder %s2412_s16, %s2963_s11 }
  0x5b   :  { %p2418_p0 = pnand %p2416_p13, %p2413_p12 }
  0x5d   :  { %2421 = shalt.err (!%p2418_p0)
}
  0x5e   :  { %s2422_s25 = scalar_lea.vmem %s2623_s18, 2048  ;;  %p2427_p2 = scmp.lt.s32.totalorder %s2623_s18, %s2623_s18 }
  0x5f   :  { %p2423_p1 = scmp.ne.s32.totalorder %s2623_s18, %s2422_s25  ;;  %p2428_p3 = scmp.lt.s32.totalorder %s2422_s25, %s2422_s25 }
  0x61   :  { %p2429_p4 = por %p2428_p3, %p2427_p2 }
  0x63   :  { %p2430_p5 = pnand %p2429_p4, %p2423_p1 }
  0x65   :  { %2433 = shalt.err (!%p2430_p5)
}
  0x66   :  { %106 = dma.hbm_to_vmem [thread:$0]  %s2963_s11, 2048, %s2623_s18, [#allocation13], %s2470_s1, %s2470_s1, %s2471_s26  }
  0x67   :  { %2456 = dma.done.wait [#allocation4], 512  }
  0x68   :  { %2457 = vsyncadd [#allocation4], 4294966784 }
  0x69   :  { %2458 = dma.done.wait [#allocation7], 3584  }
  0x6a   :  { %2459 = vsyncadd [#allocation7], 4294963712 }
  0x6b   :  { %2460 = dma.done.wait [#allocation10], 3072  }
  0x6c   :  { %2461 = vsyncadd [#allocation10], 4294964224 }
  0x6d   :  { %2462 = dma.done.wait [#allocation13], 2048  }
  0x6e   :  { %2463 = vsyncadd [#allocation13], 4294965248  ;;  %v128_v0 = vld [vmem:[#allocation3] sm:$0xff]  ;;  %v130_v1 = vld [vmem:[#allocation3 + $0x10] sm:$0xff]  ;;  %v2478_v39 = vmov 0   ;;  %vm473_vm0 = vcmask 261120  }
  0x6f   :  { %v129_v2 = vld [vmem:[#allocation3 + $0x8] sm:$0xff]  ;;  %138 = vadd.xlane.f32.xlu0 %v128_v0  ;;  %142 = vadd.xlane.f32.xlu1 %v130_v1  ;;  %v131_v3 = vld [vmem:[#allocation3 + $0x18] sm:$0xff]  ;;  %v2122_v4 = vld [vmem:[#allocation8 + $0x4] ss:$12 sps:$4 sm:$0xff]   ;;  %vm832_vm1 = vcmask 523520   ;;  %vm1021_vm2 = vcmask 785920  }
  0x70   :  { %v2124_v5 = vld [vmem:[#allocation8] ss:$12 sps:$4 sm:$0xff]   ;;  %v2125_v6 = vld [vmem:[#allocation8 + $0x1c] ss:$12 sps:$4 sm:$0xff]   ;;  %365 = vmatprep.subr.bf16.mxu0 %v2122_v4  ;;  %v2128_v24 = vld [vmem:[#allocation8 + $0x18] ss:$12 sps:$4 sm:$0xff]   ;;  %397 = vmatprep.mubr.bf16.mxu0 %v2478_v39 }
  0x71   :  { %v2127_v7 = vld [vmem:[#allocation8 + $0x8] ss:$12 sps:$4 sm:$0xff]   ;;  %366 = vmatpush1.bf16.msra.mxu0 %v2124_v5  ;;  %v2131_v26 = vld [vmem:[#allocation8 + $0x20] ss:$12 sps:$4 sm:$0xff]   ;;  %v2132_v27 = vld [vmem:[#allocation8 + $0x30] ss:$12 sps:$4 sm:$0xff]  }
  0x72   :  { %1994 = vmatprep.subr.bf16.mxu1 %v2127_v7  ;;  %367 = vmatprep.subr.bf16.mxu0 %v2125_v6  ;;  %v2129_v25 = vld [vmem:[#allocation8 + $0x34] ss:$12 sps:$4 sm:$0xff]   ;;  %v2133_v28 = vld [vmem:[#allocation8 + $0x4c] ss:$12 sps:$4 sm:$0xff]   ;;  %v2137_v31 = vld [vmem:[#allocation8 + $0x64] ss:$12 sps:$4 sm:$0xff]  }
  0x73   :  { %140 = vadd.xlane.f32.xlu0 %v129_v2  ;;  %144 = vadd.xlane.f32.xlu1 %v131_v3  ;;  %v2135_v29 = vld [vmem:[#allocation8 + $0x38] ss:$12 sps:$4 sm:$0xff]   ;;  %v2136_v30 = vld [vmem:[#allocation8 + $0x48] ss:$12 sps:$4 sm:$0xff]   ;;  %v2139_v32 = vld [vmem:[#allocation8 + $0x50] ss:$12 sps:$4 sm:$0xff]  }
  0x74   :  { %1995 = vmatpush3.bf16.msra.mxu1 %v2127_v7  ;;  %v2140_v33 = vld [vmem:[#allocation8 + $0x60] ss:$12 sps:$4 sm:$0xff]   ;;  %v2141_v34 = vld [vmem:[#allocation8 + $0x7c] ss:$12 sps:$4 sm:$0xff]   ;;  %v2144_v36 = vld [vmem:[#allocation8 + $0x78] ss:$12 sps:$4 sm:$0xff]  }
  0x75   :  { %368 = vmatpush1.bf16.msra.mxu0 %v2128_v24  ;;  %1996 = vmatprep.subr.bf16.mxu1 %v2131_v26  ;;  %v2143_v35 = vld [vmem:[#allocation8 + $0x68] ss:$12 sps:$4 sm:$0xff]   ;;  %v2147_v38 = vld [vmem:[#allocation8 + $0x80] ss:$12 sps:$4 sm:$0xff]   ;;  %v2148_v40 = vld [vmem:[#allocation8 + $0x90] ss:$12 sps:$4 sm:$0xff]  }
  0x76   :  { %369 = vmatprep.subr.bf16.mxu0 %v2129_v25  ;;  %v2145_v37 = vld [vmem:[#allocation8 + $0x94] ss:$12 sps:$4 sm:$0xff]   ;;  %v2149_v41 = vld [vmem:[#allocation8 + $0xac] ss:$12 sps:$4 sm:$0xff]   ;;  %v2153_v44 = vld [vmem:[#allocation8 + $0xb0] ss:$12 sps:$4 sm:$0xff]  }
  0x77   :  { %v2151_v42 = vld [vmem:[#allocation8 + $0x98] ss:$12 sps:$4 sm:$0xff]   ;;  %v2152_v43 = vld [vmem:[#allocation8 + $0xa8] ss:$12 sps:$4 sm:$0xff]   ;;  %v1828_v59 = vld [vmem:[%s2954_s2] ss:$0 sm:$0xff] }
  0x78   :  { %1997 = vmatpush3.bf16.msra.mxu1 %v2131_v26  ;;  %s2479_s2 = smov 96   ;;  %vm1210_vm3 = vcmask 1048320  }
  0x79   :  { %370 = vmatpush1.bf16.msra.mxu0 %v2132_v27  ;;  %1998 = vmatprep.subr.bf16.mxu1 %v2135_v29 }
  0x7a   :  { %371 = vmatprep.subr.bf16.mxu0 %v2133_v28 }
  0x7c   :  { %1999 = vmatpush3.bf16.msra.mxu1 %v2135_v29 }
  0x7d   :  { %372 = vmatpush1.bf16.msra.mxu0 %v2136_v30  ;;  %2000 = vmatprep.subr.bf16.mxu1 %v2139_v32 }
  0x7e   :  { %373 = vmatprep.subr.bf16.mxu0 %v2137_v31 }
  0x80   :  { %2001 = vmatpush3.bf16.msra.mxu1 %v2139_v32 }
  0x81   :  { %374 = vmatpush1.bf16.msra.mxu0 %v2140_v33  ;;  %2002 = vmatprep.subr.bf16.mxu1 %v2143_v35  ;;  %v2716_v33 = vld [vmem:[#allocation6] sm:$0xff] }
  0x82   :  { %375 = vmatprep.subr.bf16.mxu0 %v2141_v34 }
  0x84   :  { %2003 = vmatpush3.bf16.msra.mxu1 %v2143_v35  ;;  %v2718_v35 = vld [vmem:[#allocation6 + $0x10] sm:$0xff] }
  0x85   :  { %376 = vmatpush1.bf16.msra.mxu0 %v2144_v36  ;;  %2004 = vmatprep.subr.bf16.mxu1 %v2147_v38 }
  0x86   :  { %377 = vmatprep.subr.bf16.mxu0 %v2145_v37  ;;  %v2720_v37 = vld [vmem:[#allocation6 + $0x8] sm:$0xff] }
  0x88   :  { %2005 = vmatpush3.bf16.msra.mxu1 %v2147_v38 }
  0x89   :  { %378 = vmatpush1.bf16.msra.mxu0 %v2148_v40  ;;  %2006 = vmatprep.subr.bf16.mxu1 %v2151_v42 }
  0x8a   :  { %379 = vmatprep.subr.bf16.mxu0 %v2149_v41  ;;  %v2723_v41 = vld [vmem:[#allocation6 + $0x18] sm:$0xff] }
  0x8c   :  { %2007 = vmatpush3.bf16.msra.mxu1 %v2151_v42 }
  0x8d   :  { %380 = vmatpush1.bf16.msra.mxu0 %v2152_v43  ;;  %2008 = vmatprep.subr.bf16.mxu1 %v2153_v44 }
  0x90   :  { %2009 = vmatpush3.bf16.msra.mxu1 %v2153_v44 }
  0xfc   :  { %v139_v8 = vpop.xlane.xlu0 %138  ;;  %v143_v9 = vpop.xlane.xlu1 %142 }
  0xfd   :  { %v147_v10 = vmul.f32 0.0078125, %v139_v8  ;;  %v149_v11 = vmul.f32 0.0078125, %v143_v9 }
  0xff   :  { %v2660_v12 = vsub.f32 %v128_v0, %v147_v10  ;;  %v2662_v13 = vsub.f32 %v130_v1, %v149_v11  ;;  %v1829_v0 = vld [vmem:[%s2955_s3] ss:$0 sm:$0xff]  ;;  %s2480_s3 = smov 32  }
 0x100   :  { %v141_v14 = vpop.xlane.xlu0 %140  ;;  %v145_v15 = vpop.xlane.xlu1 %144 }
 0x101   :  { %v148_v16 = vmul.f32 0.0078125, %v141_v14  ;;  %v155_v17 = vmul.f32 %v2660_v12, %v2660_v12  ;;  %v150_v18 = vmul.f32 0.0078125, %v145_v15  ;;  %v157_v21 = vmul.f32 %v2662_v13, %v2662_v13 }
 0x103   :  { %v2666_v19 = vsub.f32 %v129_v2, %v148_v16  ;;  %159 = vadd.xlane.f32.xlu0 %v155_v17  ;;  %v2668_v20 = vsub.f32 %v131_v3, %v150_v18 }
 0x105   :  { %v156_v22 = vmul.f32 %v2666_v19, %v2666_v19  ;;  %v158_v23 = vmul.f32 %v2668_v20, %v2668_v20 }
 0x107   :  { %163 = vadd.xlane.f32.xlu0 %v157_v21  ;;  %161 = vadd.xlane.f32.xlu1 %v156_v22 }
 0x10b   :  { %165 = vadd.xlane.f32.xlu1 %v158_v23 }
 0x190   :  { %v160_v45 = vpop.xlane.xlu0 %159 }
 0x191   :  { %v167_v46 = vmul.f32 0.0078125, %v160_v45 }
 0x193   :  { %v171_v47 = vadd.f32 1e-05, %v167_v46 }
 0x194   :  { %v162_v48 = vpop.xlane.xlu1 %161  ;;  %v164_v49 = vpop.xlane.xlu0 %163 }
 0x195   :  { %2202 = vrsqrt.f32 %v171_v47  ;;  %v168_v50 = vmul.f32 0.0078125, %v162_v48  ;;  %v169_v51 = vmul.f32 0.0078125, %v164_v49 }
 0x197   :  { %v172_v52 = vadd.f32 1e-05, %v168_v50  ;;  %v173_v53 = vadd.f32 1e-05, %v169_v51 }
 0x198   :  { %v166_v54 = vpop.xlane.xlu1 %165 }
 0x199   :  { %2204 = vrsqrt.f32 %v172_v52  ;;  %v170_v55 = vmul.f32 0.0078125, %v166_v54 }
 0x19a   :  { %2206 = vrsqrt.f32 %v173_v53 }
 0x19b   :  { %v174_v56 = vadd.f32 1e-05, %v170_v55 }
 0x19d   :  { %2208 = vrsqrt.f32 %v174_v56 }
 0x19f   :  { %v2203_v57 = vpop.eup %2202 }
 0x1a0   :  { %v179_v58 = vmul.f32 %v2203_v57, %v2660_v12 }
 0x1a2   :  { %v189_v63 = vmul.f32 %v1828_v59, %v179_v58 }
 0x1a3   :  { %v2205_v60 = vpop.eup %2204 }
 0x1a4   :  { %v2207_v61 = vpop.eup %2206  ;;  %v180_v62 = vmul.f32 %v2205_v60, %v2666_v19  ;;  %v199_v4 = vadd.f32 %v1829_v0, %v189_v63 }
 0x1a5   :  { %v181_v1 = vmul.f32 %v2207_v61, %v2662_v13 }
 0x1a6   :  { %v190_v2 = vmul.f32 %v1828_v59, %v180_v62 }
 0x1a7   :  { %v2209_v3 = vpop.eup %2208  ;;  %v191_v7 = vmul.f32 %v1828_v59, %v181_v1 }
 0x1a8   :  { %v200_v5 = vadd.f32 %v1829_v0, %v190_v2  ;;  %v182_v6 = vmul.f32 %v2209_v3, %v2668_v20 }
 0x1a9   :  { %v201_v10 = vadd.f32 %v1829_v0, %v191_v7 }
 0x1aa   :  { %v203_v8 = vpack.c.bf16 %v200_v5, %v199_v4  ;;  %v192_v9 = vmul.f32 %v1828_v59, %v182_v6 }
 0x1ac   :  { %398 = vmatmul.mubr.bf16.vlgmr.msra.gmra.mrb[0].mxu0 %v203_v8  ;;  %2010 = vmatprep.mubr.bf16.mxu1 %v203_v8  ;;  %v202_v11 = vadd.f32 %v1829_v0, %v192_v9 }
 0x1ad   :  { %407 = vmatprep.mubr.bf16.mxu0 %v2478_v39 }
 0x1ae   :  { %v204_v12 = vpack.c.bf16 %v202_v11, %v201_v10 }
 0x1b0   :  { %2011 = vmatmul.mubr.bf16.vlgmr.msra.gmra.mrb[0].mxu1 %v204_v12 }
 0x1b4   :  { %408 = vmatmul.mubr.bf16.gmra.mrb[4].mxu0 %v204_v12 }
 0x27f   :  { %v399_v14 = vpop.f32.mrb[0].mxu0 }
 0x280   :  { %v401_v13 = vpop.f32.mrb[1].mxu0 }
 0x281   :  { %v403_v15 = vpop.f32.mrb[2].mxu0 }
 0x282   :  { %v2688_v16 = vpack.c.bf16 %v403_v15, %v399_v14  ;;  %v405_v17 = vpop.f32.mrb[3].mxu0 }
 0x283   :  { %v2690_v18 = vpack.c.bf16 %v405_v17, %v401_v13  ;;  %v2012_v19 = vpop.f32.mrb[0].mxu1 }
 0x284   :  { %v452_v20 = vpop.f32.mrb[1].mxu1  ;;  %2018 = vmatprep.mubr.msk.bf16.mxu0 %vm473_vm0, %v2688_v16 }
 0x285   :  { %v2013_v21 = vpop.f32.mrb[2].mxu1  ;;  %2098 = vmatprep.subr.msk.bf16.mxu0 %vm473_vm0, %v2690_v18  ;;  %v481_v22 = vsel %vm473_vm0, %v2690_v18, 0 }
 0x286   :  { %v2698_v23 = vpack.c.bf16 %v2013_v21, %v2012_v19  ;;  %v455_v24 = vpop.f32.mrb[3].mxu1  ;;  %2015 = vmatpush3.bf16.xpose.msra.mxu0 %v481_v22 }
 0x287   :  { %v2700_v25 = vpack.c.bf16 %v455_v24, %v452_v20  ;;  %v409_v26 = vpop.f32.mrb[4].mxu0 }
 0x288   :  { %v411_v27 = vpop.f32.mrb[5].mxu0 }
 0x289   :  { %v413_v28 = vpop.f32.mrb[6].mxu0  ;;  %2022 = vmatprep.subr.bf16.mxu1 %v2700_v25 }
 0x28a   :  { %v2703_v29 = vpack.c.bf16 %v413_v28, %v409_v26  ;;  %v415_v30 = vpop.f32.mrb[7].mxu0  ;;  %2023 = vmatpush3.bf16.msra.mxu1 %v2700_v25 }
 0x28b   :  { %v2706_v31 = vpack.c.bf16 %v415_v30, %v411_v27  ;;  %2024 = vmatprep.subr.bf16.mxu1 %v2698_v23 }
 0x28d   :  { %2099 = vmatprep.subr.msk.bf16.mxu0 %vm473_vm0, %v2706_v31  ;;  %v484_v32 = vsel %vm473_vm0, %v2706_v31, 0 }
 0x28e   :  { %2017 = vmatpush3.bf16.xpose.msra.mxu0 %v484_v32  ;;  %2025 = vmatpush3.bf16.msra.mxu1 %v2698_v23 }
 0x295   :  { %2019 = vmatmul.mubr.msk.bf16.vlgmr.msra.gmra.mrb[8].mxu0 %vm473_vm0, %v2703_v29 }
 0x368   :  { %v2020_v34 = vpop.f32.mrb[8].mxu0 }
 0x369   :  { %v520_v36 = vpop.f32.mrb[9].mxu0  ;;  %v529_v43 = vadd.f32 %v2020_v34, %v2718_v35 }
 0x36a   :  { %v521_v38 = vadd.f32 %v520_v36, %v2716_v33  ;;  %v2021_v40 = vpop.f32.mrb[10].mxu0 }
 0x36b   :  { %v523_v42 = vpop.f32.mrb[11].mxu0  ;;  %v532_v46 = vadd.f32 %v2021_v40, %v2723_v41  ;;  %v541_v48 = vsel %vm473_vm0, %v529_v43, -inf }
 0x36c   :  { %v524_v44 = vadd.f32 %v523_v42, %v2720_v37  ;;  %v535_v45 = vsel %vm473_vm0, %v521_v38, -inf }
 0x36d   :  { %536 = vmax.xlane.f32.xlu0 %v535_v45  ;;  %v544_v49 = vsel %vm473_vm0, %v532_v46, -inf }
 0x36e   :  { %v538_v47 = vsel %vm473_vm0, %v524_v44, -inf }
 0x36f   :  { %539 = vmax.xlane.f32.xlu1 %v538_v47 }
 0x371   :  { %542 = vmax.xlane.f32.xlu0 %v541_v48 }
 0x373   :  { %545 = vmax.xlane.f32.xlu1 %v544_v49 }
 0x3fa   :  { %v537_v50 = vpop.xlane.xlu0 %536 }
 0x3fb   :  { %v547_v51 = vsub.f32 %v521_v38, %v537_v50 }
 0x3fc   :  { %v540_v52 = vpop.xlane.xlu1 %539 }
 0x3fd   :  { %v548_v53 = vsub.f32 %v524_v44, %v540_v52  ;;  %v551_v57 = vmul.f32 1.442695, %v547_v51 }
 0x3fe   :  { %v543_v54 = vpop.xlane.xlu0 %542 }
 0x3ff   :  { %v553_v55 = vmul.f32 1.442695, %v548_v53  ;;  %v549_v56 = vsub.f32 %v529_v43, %v543_v54 }
 0x400   :  { %v546_v58 = vpop.xlane.xlu1 %545 }
 0x401   :  { %2210 = vpow2.f32 %v553_v55  ;;  %v555_v59 = vmul.f32 1.442695, %v549_v56  ;;  %v550_v60 = vsub.f32 %v532_v46, %v546_v58 }
 0x403   :  { %2212 = vpow2.f32 %v555_v59  ;;  %v557_v61 = vmul.f32 1.442695, %v550_v60 }
 0x404   :  { %2214 = vpow2.f32 %v551_v57 }
 0x405   :  { %2216 = vpow2.f32 %v557_v61 }
 0x40b   :  { %v2211_v62 = vpop.eup %2210 }
 0x40c   :  { %v562_v63 = vsel %vm473_vm0, %v2211_v62, 0.0 }
 0x40d   :  { %v2213_v0 = vpop.eup %2212  ;;  %563 = vadd.xlane.f32.xlu1 %v562_v63 }
 0x40e   :  { %v2215_v1 = vpop.eup %2214  ;;  %v565_v2 = vsel %vm473_vm0, %v2213_v0, 0.0 }
 0x40f   :  { %v2217_v3 = vpop.eup %2216  ;;  %566 = vadd.xlane.f32.xlu0 %v565_v2  ;;  %v559_v5 = vsel %vm473_vm0, %v2215_v1, 0.0 }
 0x410   :  { %v568_v4 = vsel %vm473_vm0, %v2217_v3, 0.0 }
 0x411   :  { %569 = vadd.xlane.f32.xlu1 %v568_v4 }
 0x413   :  { %560 = vadd.xlane.f32.xlu0 %v559_v5 }
 0x422   :  { %650 = vrot.lane.b32.xlu1 %v2706_v31, %s2479_s2 }
 0x426   :  { %642 = vrot.lane.b32.xlu1 %v2688_v16, %s2479_s2 }
 0x429   :  { %648 = vrot.lane.b32.xlu0 %v2690_v18, %s2479_s2 }
 0x42a   :  { %839 = vrot.lane.b32.xlu1 %v2690_v18, %s2470_s1 }
 0x42d   :  { %644 = vrot.lane.b32.xlu0 %v2703_v29, %s2479_s2 }
 0x42e   :  { %841 = vrot.lane.b32.xlu1 %v2706_v31, %s2470_s1 }
 0x431   :  { %835 = vrot.lane.b32.xlu0 %v2688_v16, %s2470_s1 }
 0x432   :  { %837 = vrot.lane.b32.xlu1 %v2703_v29, %s2470_s1 }
 0x49a   :  { %v564_v6 = vpop.xlane.xlu1 %563 }
 0x49b   :  { %2218 = vrcp.f32 %v564_v6 }
 0x49c   :  { %v567_v7 = vpop.xlane.xlu0 %566 }
 0x49e   :  { %v570_v8 = vpop.xlane.xlu1 %569 }
 0x49f   :  { %2220 = vrcp.f32 %v570_v8 }
 0x4a0   :  { %2222 = vrcp.f32 %v567_v7  ;;  %v561_v9 = vpop.xlane.xlu0 %560 }
 0x4a1   :  { %2224 = vrcp.f32 %v561_v9 }
 0x4a2   :  { %v651_v17 = vpop.permute.xlu1 %650 }
 0x4a3   :  { %v662_v28 = vsel %vm473_vm0, %v651_v17, 0 }
 0x4a4   :  { %v649_v10 = vpop.permute.xlu0 %648 }
 0x4a5   :  { %2100 = vmatprep.subr.msk.bf16.mxu1 %vm473_vm0, %v649_v10  ;;  %v2219_v11 = vpop.eup %2218  ;;  %v659_v26 = vsel %vm473_vm0, %v649_v10, 0 }
 0x4a6   :  { %v576_v20 = vmul.f32 %v2219_v11, %v2211_v62  ;;  %v643_v27 = vpop.permute.xlu1 %642 }
 0x4a8   :  { %v645_v32 = vpop.permute.xlu0 %644 }
 0x4a9   :  { %v2221_v12 = vpop.eup %2220 }
 0x4aa   :  { %v2223_v14 = vpop.eup %2222  ;;  %v578_v15 = vmul.f32 %v2221_v12, %v2217_v3  ;;  %v840_v30 = vpop.permute.xlu1 %839 }
 0x4ab   :  { %v2225_v13 = vpop.eup %2224  ;;  %v577_v21 = vmul.f32 %v2223_v14, %v2213_v0  ;;  %v850_v34 = vsel %vm473_vm0, %v840_v30, 0 }
 0x4ac   :  { %v575_v19 = vmul.f32 %v2225_v13, %v2215_v1  ;;  %v836_v36 = vpop.permute.xlu0 %835 }
 0x4ad   :  { %v580_v24 = vpack.c.bf16 %v578_v15, %v577_v21 }
 0x4ae   :  { %v579_v22 = vpack.c.bf16 %v576_v20, %v575_v19  ;;  %v842_v38 = vpop.permute.xlu1 %841 }
 0x4af   :  { %v853_v40 = vsel %vm473_vm0, %v842_v38, 0 }
 0x4b0   :  { %2026 = vmatprep.mubr.msk.bf16.mxu1 %vm473_vm0, %v579_v22 }
 0x4b1   :  { %2027 = vmatmul.mubr.msk.bf16.vlgmr.msra.gmra.mrb[4].mxu1 %vm473_vm0, %v580_v24 }
 0x4b2   :  { %2031 = vmatpush3.bf16.xpose.msra.mxu1 %v659_v26  ;;  %2034 = vmatprep.mubr.msk.bf16.mxu1 %vm473_vm0, %v643_v27  ;;  %v838_v42 = vpop.permute.xlu1 %837 }
 0x4b3   :  { %2101 = vmatprep.subr.msk.bf16.mxu1 %vm473_vm0, %v651_v17 }
 0x4ba   :  { %2033 = vmatpush3.bf16.xpose.msra.mxu1 %v662_v28 }
 0x4bb   :  { %2102 = vmatprep.subr.msk.bf16.mxu1 %vm473_vm0, %v840_v30 }
 0x4c1   :  { %2035 = vmatmul.mubr.msk.bf16.vlgmr.msra.gmra.mrb[8].mxu1 %vm473_vm0, %v645_v32 }
 0x4c2   :  { %2047 = vmatpush3.bf16.xpose.msra.mxu1 %v850_v34  ;;  %2050 = vmatprep.mubr.msk.bf16.mxu1 %vm473_vm0, %v836_v36 }
 0x4c3   :  { %2103 = vmatprep.subr.msk.bf16.mxu1 %vm473_vm0, %v842_v38 }
 0x4ca   :  { %2049 = vmatpush3.bf16.xpose.msra.mxu1 %v853_v40 }
 0x4d1   :  { %2051 = vmatmul.mubr.msk.bf16.vlgmr.msra.gmra.mrb[12].mxu1 %vm473_vm0, %v838_v42 }
 0x584   :  { %v2028_v43 = vpop.f32.mrb[4].mxu1 }
 0x585   :  { %v621_v44 = vpop.f32.mrb[5].mxu1 }
 0x586   :  { %v2029_v45 = vpop.f32.mrb[6].mxu1 }
 0x587   :  { %v637_v46 = vpack.c.bf16 %v2029_v45, %v2028_v43  ;;  %v624_v47 = vpop.f32.mrb[7].mxu1 }
 0x588   :  { %v636_v48 = vpack.c.bf16 %v624_v47, %v621_v44 }
 0x589   :  { %639 = vst.msk [vmem:[#allocation2 + $0x8] sm:$0xff] %vm473_vm0, %v637_v46 }
 0x58a   :  { %638 = vst.msk [vmem:[#allocation2] sm:$0xff] %vm473_vm0, %v636_v48 }
 0x594   :  { %v2036_v49 = vpop.f32.mrb[8].mxu1 }
 0x595   :  { %v698_v50 = vpop.f32.mrb[9].mxu1  ;;  %v2796_v26 = vadd.f32 %v2036_v49, %v2718_v35 }
 0x596   :  { %v2037_v51 = vpop.f32.mrb[10].mxu1  ;;  %v2793_v24 = vadd.f32 %v698_v50, %v2716_v33 }
 0x597   :  { %v701_v52 = vpop.f32.mrb[11].mxu1  ;;  %v2801_v27 = vadd.f32 %v2037_v51, %v2723_v41 }
 0x5a4   :  { %v2052_v53 = vpop.f32.mrb[12].mxu1 }
 0x5a5   :  { %v889_v54 = vpop.f32.mrb[13].mxu1  ;;  %v898_v58 = vadd.f32 %v2052_v53, %v2718_v35 }
 0x5a6   :  { %v890_v55 = vadd.f32 %v889_v54, %v2716_v33  ;;  %v2053_v56 = vpop.f32.mrb[14].mxu1 }
 0x5a7   :  { %v892_v57 = vpop.f32.mrb[15].mxu1  ;;  %v901_v62 = vadd.f32 %v2053_v56, %v2723_v41  ;;  %v910_v63 = vsel %vm473_vm0, %v898_v58, -inf }
 0x5a8   :  { %v893_v59 = vadd.f32 %v892_v57, %v2720_v37  ;;  %v904_v60 = vsel %vm473_vm0, %v890_v55, -inf }
 0x5a9   :  { %905 = vmax.xlane.f32.xlu0 %v904_v60  ;;  %v913_v0 = vsel %vm473_vm0, %v901_v62, -inf }
 0x5aa   :  { %v907_v61 = vsel %vm473_vm0, %v893_v59, -inf }
 0x5ab   :  { %908 = vmax.xlane.f32.xlu1 %v907_v61 }
 0x5ad   :  { %911 = vmax.xlane.f32.xlu0 %v910_v63 }
 0x5b1   :  { %914 = vmax.xlane.f32.xlu0 %v913_v0 }
 0x5bc   :  { %952 = vrot.lane.b32.xlu1 %v2698_v23, %s2470_s1 }
 0x636   :  { %v906_v1 = vpop.xlane.xlu0 %905 }
 0x637   :  { %v916_v2 = vsub.f32 %v890_v55, %v906_v1 }
 0x638   :  { %v909_v3 = vpop.xlane.xlu1 %908 }
 0x639   :  { %v920_v6 = vmul.f32 1.442695, %v916_v2  ;;  %v917_v7 = vsub.f32 %v893_v59, %v909_v3 }
 0x63a   :  { %v912_v4 = vpop.xlane.xlu0 %911 }
 0x63b   :  { %v918_v5 = vsub.f32 %v898_v58, %v912_v4  ;;  %v922_v11 = vmul.f32 1.442695, %v917_v7 }
 0x63c   :  { %v953_v30 = vpop.permute.xlu1 %952 }
 0x63d   :  { %v924_v8 = vmul.f32 1.442695, %v918_v5 }
 0x63e   :  { %v915_v9 = vpop.xlane.xlu0 %914 }
 0x63f   :  { %2226 = vpow2.f32 %v924_v8  ;;  %v919_v10 = vsub.f32 %v901_v62, %v915_v9 }
 0x640   :  { %2228 = vpow2.f32 %v920_v6 }
 0x641   :  { %v926_v12 = vmul.f32 1.442695, %v919_v10 }
 0x643   :  { %2230 = vpow2.f32 %v926_v12 }
 0x644   :  { %2232 = vpow2.f32 %v922_v11 }
 0x649   :  { %v2227_v14 = vpop.eup %2226 }
 0x64a   :  { %v934_v13 = vsel %vm473_vm0, %v2227_v14, 0.0  ;;  %v2229_v15 = vpop.eup %2228 }
 0x64b   :  { %935 = vadd.xlane.f32.xlu0 %v934_v13  ;;  %v928_v19 = vsel %vm473_vm0, %v2229_v15, 0.0 }
 0x64d   :  { %v2231_v17 = vpop.eup %2230 }
 0x64e   :  { %v937_v20 = vsel %vm473_vm0, %v2231_v17, 0.0  ;;  %v2233_v21 = vpop.eup %2232 }
 0x64f   :  { %929 = vadd.xlane.f32.xlu0 %v928_v19  ;;  %938 = vadd.xlane.f32.xlu1 %v937_v20  ;;  %v931_v22 = vsel %vm473_vm0, %v2233_v21, 0.0 }
 0x653   :  { %932 = vadd.xlane.f32.xlu1 %v931_v22 }
 0x664   :  { %1028 = vrot.lane.b32.xlu1 %v2690_v18, %s2480_s3  ;;  %v713_v18 = vsel %vm473_vm0, %v2793_v24, -inf }
 0x665   :  { %950 = vrot.lane.b32.xlu0 %v2700_v25, %s2470_s1 }
 0x668   :  { %1030 = vrot.lane.b32.xlu1 %v2706_v31, %s2480_s3  ;;  %v702_v31 = vadd.f32 %v701_v52, %v2720_v37 }
 0x669   :  { %1024 = vrot.lane.b32.xlu0 %v2688_v16, %s2480_s3  ;;  %v719_v16 = vsel %vm473_vm0, %v2796_v26, -inf }
 0x66a   :  { %v716_v28 = vsel %vm473_vm0, %v702_v31, -inf }
 0x66c   :  { %1026 = vrot.lane.b32.xlu1 %v2703_v29, %s2480_s3  ;;  %v722_v29 = vsel %vm473_vm0, %v2801_v27, -inf }
 0x688   :  { %714 = vmax.xlane.f32.xlu0 %v713_v18 }
 0x68c   :  { %720 = vmax.xlane.f32.xlu0 %v719_v16 }
 0x690   :  { %723 = vmax.xlane.f32.xlu0 %v722_v29  ;;  %717 = vmax.xlane.f32.xlu1 %v716_v28 }
 0x6d8   :  { %v936_v32 = vpop.xlane.xlu0 %935 }
 0x6dc   :  { %v939_v34 = vpop.xlane.xlu1 %938  ;;  %v930_v36 = vpop.xlane.xlu0 %929 }
 0x6dd   :  { %2234 = vrcp.f32 %v939_v34 }
 0x6de   :  { %2236 = vrcp.f32 %v930_v36 }
 0x6df   :  { %2238 = vrcp.f32 %v936_v32 }
 0x6e0   :  { %v933_v38 = vpop.xlane.xlu1 %932  ;;  %v951_v40 = vpop.permute.xlu0 %950 }
 0x6e1   :  { %2240 = vrcp.f32 %v933_v38  ;;  %2054 = vmatprep.subr.bf16.mxu1 %v951_v40 }
 0x6e2   :  { %2055 = vmatpush3.bf16.msra.mxu1 %v951_v40 }
 0x6e3   :  { %2056 = vmatprep.subr.bf16.mxu1 %v953_v30 }
 0x6e4   :  { %v1029_v42 = vpop.permute.xlu1 %1028  ;;  %v1025_v54 = vpop.permute.xlu0 %1024 }
 0x6e5   :  { %v1039_v53 = vsel %vm473_vm0, %v1029_v42, 0 }
 0x6e6   :  { %2057 = vmatpush3.bf16.msra.mxu1 %v953_v30 }
 0x6e7   :  { %2104 = vmatprep.subr.msk.bf16.mxu1 %vm473_vm0, %v1029_v42  ;;  %v2235_v43 = vpop.eup %2234 }
 0x6e8   :  { %v2237_v44 = vpop.eup %2236  ;;  %v947_v47 = vmul.f32 %v2235_v43, %v2231_v17  ;;  %v1031_v55 = vpop.permute.xlu1 %1030 }
 0x6e9   :  { %v2239_v45 = vpop.eup %2238  ;;  %v944_v48 = vmul.f32 %v2237_v44, %v2229_v15  ;;  %v1042_v56 = vsel %vm473_vm0, %v1031_v55, 0 }
 0x6ea   :  { %v946_v50 = vmul.f32 %v2239_v45, %v2227_v14 }
 0x6eb   :  { %v2241_v46 = vpop.eup %2240 }
 0x6ec   :  { %v945_v49 = vmul.f32 %v2241_v46, %v2233_v21  ;;  %v949_v52 = vpack.c.bf16 %v947_v47, %v946_v50  ;;  %v1027_v57 = vpop.permute.xlu1 %1026 }
 0x6ee   :  { %v948_v51 = vpack.c.bf16 %v945_v49, %v944_v48 }
 0x6f0   :  { %2058 = vmatprep.mubr.msk.bf16.mxu1 %vm473_vm0, %v948_v51 }
 0x6f1   :  { %2059 = vmatmul.mubr.msk.bf16.vlgmr.msra.gmra.mrb[16].mxu1 %vm473_vm0, %v949_v52 }
 0x6f2   :  { %2063 = vmatpush3.bf16.xpose.msra.mxu1 %v1039_v53  ;;  %2066 = vmatprep.mubr.msk.bf16.mxu1 %vm473_vm0, %v1025_v54 }
 0x6f3   :  { %2105 = vmatprep.subr.msk.bf16.mxu1 %vm473_vm0, %v1031_v55 }
 0x6fa   :  { %2065 = vmatpush3.bf16.xpose.msra.mxu1 %v1042_v56 }
 0x701   :  { %2067 = vmatmul.mubr.msk.bf16.vlgmr.msra.gmra.mrb[20].mxu1 %vm473_vm0, %v1027_v57 }
 0x702   :  { %1551 = vmatprep.mubr.bf16.mxu1 %v2478_v39 }
 0x715   :  { %v715_v58 = vpop.xlane.xlu0 %714 }
 0x716   :  { %v725_v3 = vsub.f32 %v2793_v24, %v715_v58 }
 0x718   :  { %v729_v6 = vmul.f32 1.442695, %v725_v3 }
 0x719   :  { %v721_v0 = vpop.xlane.xlu0 %720 }
 0x71a   :  { %v727_v7 = vsub.f32 %v2796_v26, %v721_v0  ;;  %2242 = vpow2.f32 %v729_v6 }
 0x71c   :  { %v733_v10 = vmul.f32 1.442695, %v727_v7 }
 0x71d   :  { %v718_v2 = vpop.xlane.xlu1 %717  ;;  %v724_v5 = vpop.xlane.xlu0 %723 }
 0x71e   :  { %v726_v4 = vsub.f32 %v702_v31, %v718_v2  ;;  %v728_v9 = vsub.f32 %v2801_v27, %v724_v5 }
 0x720   :  { %v731_v8 = vmul.f32 1.442695, %v726_v4  ;;  %v735_v12 = vmul.f32 1.442695, %v728_v9 }
 0x722   :  { %2244 = vpow2.f32 %v731_v8 }
 0x723   :  { %2246 = vpow2.f32 %v733_v10 }
 0x724   :  { %2248 = vpow2.f32 %v735_v12  ;;  %v2243_v18 = vpop.eup %2242 }
 0x72c   :  { %v2245_v27 = vpop.eup %2244 }
 0x72d   :  { %v740_v31 = vsel %vm473_vm0, %v2245_v27, 0.0 }
 0x7c4   :  { %v2818_v59 = vpop.f32.mrb[16].mxu1 }
 0x7c5   :  { %v2820_v60 = vpop.f32.mrb[17].mxu1 }
 0x7c6   :  { %v2822_v61 = vpop.f32.mrb[18].mxu1 }
 0x7c7   :  { %v1012_v62 = vpack.c.bf16 %v2822_v61, %v2818_v59  ;;  %v2826_v63 = vpop.f32.mrb[19].mxu1 }
 0x7c8   :  { %v1011_v1 = vpack.c.bf16 %v2826_v63, %v2820_v60 }
 0x7d4   :  { %v2068_v11 = vpop.f32.mrb[20].mxu1 }
 0x7d5   :  { %v1078_v14 = vpop.f32.mrb[21].mxu1  ;;  %v1087_v19 = vadd.f32 %v2068_v11, %v2718_v35  ;;  %v737_v35 = vsel %vm473_vm0, %v2243_v18, 0.0 }
 0x7d6   :  { %v1079_v13 = vadd.f32 %v1078_v14, %v2716_v33  ;;  %v2069_v15 = vpop.f32.mrb[22].mxu1 }
 0x7d7   :  { %v1081_v17 = vpop.f32.mrb[23].mxu1  ;;  %v1090_v22 = vadd.f32 %v2069_v15, %v2723_v41  ;;  %v1099_v26 = vsel %vm473_vm0, %v1087_v19, -inf }
 0x7d8   :  { %v1082_v20 = vadd.f32 %v1081_v17, %v2720_v37  ;;  %v1093_v21 = vsel %vm473_vm0, %v1079_v13, -inf  ;;  %v2842_v37 = vpop.eup %2246 }
 0x7d9   :  { %1094 = vmax.xlane.f32.xlu0 %v1093_v21  ;;  %v1102_v33 = vsel %vm473_vm0, %v1090_v22, -inf  ;;  %v2845_v16 = vpop.eup %2248  ;;  %v743_v41 = vsel %vm473_vm0, %v2842_v37, 0.0 }
 0x7da   :  { %v1096_v24 = vsel %vm473_vm0, %v1082_v20, -inf  ;;  %v746_v29 = vsel %vm473_vm0, %v2845_v16, 0.0 }
 0x7db   :  { %1097 = vmax.xlane.f32.xlu1 %v1096_v24 }
 0x7dd   :  { %1100 = vmax.xlane.f32.xlu0 %v1099_v26 }
 0x7df   :  { %1103 = vmax.xlane.f32.xlu1 %v1102_v33 }
 0x7e1   :  { %738 = vadd.xlane.f32.xlu0 %v737_v35 }
 0x7e3   :  { %741 = vadd.xlane.f32.xlu1 %v740_v31  ;;  %v2155_v31 = vld [vmem:[#allocation9 + $0x8] sm:$0xff]  }
 0x7e5   :  { %744 = vadd.xlane.f32.xlu0 %v743_v41  ;;  %v2157_v41 = vld [vmem:[#allocation9 + $0x18] sm:$0xff]  }
 0x7e7   :  { %747 = vadd.xlane.f32.xlu1 %v746_v29  ;;  %v2158_v29 = vld [vmem:[#allocation9 + $0x20] sm:$0xff]  }
 0x7f8   :  { %763 = vrot.lane.b32.xlu1 %v2698_v23, %s2479_s2 }
 0x7fc   :  { %1139 = vrot.lane.b32.xlu1 %v2700_v25, %s2480_s3 }
 0x866   :  { %v1095_v28 = vpop.xlane.xlu0 %1094 }
 0x867   :  { %v1105_v30 = vsub.f32 %v1079_v13, %v1095_v28  ;;  %v2159_v28 = vld [vmem:[#allocation9 + $0x28] sm:$0xff]  }
 0x868   :  { %v1098_v32 = vpop.xlane.xlu1 %1097 }
 0x869   :  { %v1109_v34 = vmul.f32 1.442695, %v1105_v30  ;;  %v1106_v38 = vsub.f32 %v1082_v20, %v1098_v32 }
 0x86a   :  { %v1101_v36 = vpop.xlane.xlu0 %1100 }
 0x86b   :  { %v1107_v40 = vsub.f32 %v1087_v19, %v1101_v36  ;;  %2250 = vpow2.f32 %v1109_v34  ;;  %v1111_v46 = vmul.f32 1.442695, %v1106_v38  ;;  %v2160_v34 = vld [vmem:[#allocation9 + $0x30] sm:$0xff]   ;;  %v2161_v36 = vld [vmem:[#allocation9 + $0x38] sm:$0xff]  }
 0x86c   :  { %v1104_v42 = vpop.xlane.xlu1 %1103 }
 0x86d   :  { %v1113_v43 = vmul.f32 1.442695, %v1107_v40  ;;  %v1108_v44 = vsub.f32 %v1090_v22, %v1104_v42 }
 0x86e   :  { %v739_v45 = vpop.xlane.xlu0 %738 }
 0x86f   :  { %2252 = vpow2.f32 %v1113_v43  ;;  %v1115_v47 = vmul.f32 1.442695, %v1108_v44 }
 0x870   :  { %2254 = vrcp.f32 %v739_v45  ;;  %v742_v48 = vpop.xlane.xlu1 %741 }
 0x871   :  { %2256 = vpow2.f32 %v1115_v47 }
 0x872   :  { %2258 = vrcp.f32 %v742_v48  ;;  %v745_v6 = vpop.xlane.xlu0 %744 }
 0x873   :  { %2260 = vpow2.f32 %v1111_v46 }
 0x874   :  { %v748_v4 = vpop.xlane.xlu1 %747 }
 0x875   :  { %v2251_v49 = vpop.eup %2250  ;;  %2262 = vrcp.f32 %v748_v4  ;;  %v2300_v4 = vld [vmem:[#allocation3 + $0x8] sm:$0xff] }
 0x876   :  { %v1117_v0 = vsel %vm473_vm0, %v2251_v49, 0.0  ;;  %2264 = vrcp.f32 %v745_v6 }
 0x878   :  { %v764_v5 = vpop.permute.xlu1 %763 }
 0x879   :  { %v2253_v50 = vpop.eup %2252 }
 0x87a   :  { %v2255_v51 = vpop.eup %2254  ;;  %v1123_v52 = vsel %vm473_vm0, %v2253_v50, 0.0 }
 0x87b   :  { %v2257_v53 = vpop.eup %2256  ;;  %1124 = vadd.xlane.f32.xlu0 %v1123_v52  ;;  %v753_v57 = vmul.f32 %v2255_v51, %v2243_v18 }
 0x87c   :  { %v2259_v54 = vpop.eup %2258  ;;  %v1126_v55 = vsel %vm473_vm0, %v2257_v53, 0.0  ;;  %v1140_v7 = vpop.permute.xlu1 %1139 }
 0x87d   :  { %v2261_v56 = vpop.eup %2260  ;;  %1127 = vadd.xlane.f32.xlu1 %v1126_v55  ;;  %v754_v58 = vmul.f32 %v2259_v54, %v2245_v27  ;;  %v2298_v55 = vld [vmem:[#allocation3] sm:$0xff] }
 0x87e   :  { %v1120_v3 = vsel %vm473_vm0, %v2261_v56, 0.0 }
 0x87f   :  { %1118 = vadd.xlane.f32.xlu0 %v1117_v0  ;;  %v757_v2 = vpack.c.bf16 %v754_v58, %v753_v57  ;;  %v2263_v12 = vpop.eup %2262  ;;  %v2299_v0 = vld [vmem:[#allocation3 + $0x10] sm:$0xff] }
 0x881   :  { %2042 = vmatprep.mubr.msk.bf16.mxu0 %vm473_vm0, %v757_v2  ;;  %1121 = vadd.xlane.f32.xlu1 %v1120_v3 }
 0x892   :  { %1141 = vrot.lane.b32.xlu1 %v2698_v23, %s2480_s3  ;;  %v2265_v23 = vpop.eup %2264 }
 0x893   :  { %v755_v13 = vmul.f32 %v2265_v23, %v2842_v37  ;;  %v2154_v37 = vld [vmem:[#allocation9] sm:$0xff]   ;;  %v2165_v23 = vld [vmem:[#allocation11 + $0x10] ss:$8 sps:$4 sm:$0xff]  }
 0x895   :  { %761 = vrot.lane.b32.xlu0 %v2700_v25, %s2479_s2  ;;  %v756_v25 = vmul.f32 %v2263_v12, %v2845_v16  ;;  %v2156_v16 = vld [vmem:[#allocation9 + $0x10] sm:$0xff]   ;;  %v2164_v12 = vld [vmem:[#allocation11 + $0x4] ss:$8 sps:$4 sm:$0xff]  }
 0x896   :  { %1519 = vmatprep.subr.bf16.mxu1 %v2164_v12 }
 0x897   :  { %v758_v17 = vpack.c.bf16 %v756_v25, %v755_v13 }
 0x908   :  { %v1125_v8 = vpop.xlane.xlu0 %1124 }
 0x90a   :  { %v1128_v9 = vpop.xlane.xlu1 %1127 }
 0x90c   :  { %v1119_v10 = vpop.xlane.xlu0 %1118 }
 0x90d   :  { %2266 = vrcp.f32 %v1119_v10 }
 0x90e   :  { %2268 = vrcp.f32 %v1128_v9  ;;  %v1122_v11 = vpop.xlane.xlu1 %1121 }
 0x90f   :  { %2270 = vrcp.f32 %v1122_v11  ;;  %v2162_v11 = vld [vmem:[#allocation11] ss:$8 sps:$4 sm:$0xff]  }
 0x910   :  { %2272 = vrcp.f32 %v1125_v8  ;;  %v762_v14 = vpop.permute.xlu0 %761  ;;  %v2301_v8 = vld [vmem:[#allocation3 + $0x18] sm:$0xff]  ;;  %1520 = vmatpush1.bf16.msra.mxu1 %v2162_v11 }
 0x911   :  { %2038 = vmatprep.subr.bf16.mxu0 %v762_v14 }
 0x912   :  { %2039 = vmatpush3.bf16.msra.mxu0 %v762_v14  ;;  %v1142_v22 = vpop.permute.xlu1 %1141  ;;  %v2167_v14 = vld [vmem:[#allocation11 + $0x14] ss:$8 sps:$4 sm:$0xff]  }
 0x913   :  { %2040 = vmatprep.subr.bf16.mxu0 %v764_v5  ;;  %1521 = vmatprep.subr.bf16.mxu1 %v2167_v14 }
 0x914   :  { %1522 = vmatpush1.bf16.msra.mxu1 %v2165_v23 }
 0x916   :  { %2041 = vmatpush3.bf16.msra.mxu0 %v764_v5 }
 0x917   :  { %v2267_v15 = vpop.eup %2266  ;;  %2070 = vmatprep.subr.bf16.mxu0 %v1140_v7 }
 0x918   :  { %v2269_v19 = vpop.eup %2268  ;;  %v1133_v24 = vmul.f32 %v2267_v15, %v2251_v49 }
 0x919   :  { %v2271_v20 = vpop.eup %2270  ;;  %2043 = vmatmul.mubr.msk.bf16.vlgmr.msra.gmra.mrb[12].mxu0 %vm473_vm0, %v758_v17  ;;  %v1136_v18 = vmul.f32 %v2269_v19, %v2257_v53  ;;  %v1878_v53 = vld [vmem:[%s2958_s6] ss:$0 sm:$0xff] }
 0x91a   :  { %v2273_v21 = vpop.eup %2272  ;;  %2071 = vmatpush3.bf16.msra.mxu0 %v1140_v7  ;;  %v1134_v26 = vmul.f32 %v2271_v20, %v2261_v56 }
 0x91b   :  { %2072 = vmatprep.subr.bf16.mxu0 %v1142_v22  ;;  %v1135_v27 = vmul.f32 %v2273_v21, %v2253_v50 }
 0x91c   :  { %v1137_v33 = vpack.c.bf16 %v1134_v26, %v1133_v24 }
 0x91d   :  { %v1138_v35 = vpack.c.bf16 %v1136_v18, %v1135_v27 }
 0x91e   :  { %2073 = vmatpush3.bf16.msra.mxu0 %v1142_v22  ;;  %2074 = vmatprep.mubr.msk.bf16.mxu0 %vm473_vm0, %v1137_v33 }
 0x91f   :  { %2078 = vmatprep.subr.bf16.mxu0 %v2154_v37 }
 0x921   :  { %2075 = vmatmul.mubr.msk.bf16.vlgmr.msra.gmra.mrb[16].mxu0 %vm473_vm0, %v1138_v35 }
 0x922   :  { %2079 = vmatpush3.bf16.msra.mxu0 %v2154_v37 }
 0x923   :  { %2080 = vmatprep.subr.bf16.mxu0 %v2155_v31 }
 0x926   :  { %2081 = vmatpush3.bf16.msra.mxu0 %v2155_v31 }
 0x927   :  { %2082 = vmatprep.subr.bf16.mxu0 %v2156_v16 }
 0x92a   :  { %2083 = vmatpush3.bf16.msra.mxu0 %v2156_v16  ;;  %v2170_v16 = vld [vmem:[#allocation11 + $0x24] ss:$8 sps:$4 sm:$0xff]  }
 0x92b   :  { %2084 = vmatprep.subr.bf16.mxu0 %v2157_v41  ;;  %1523 = vmatprep.subr.bf16.mxu1 %v2170_v16  ;;  %v1429_v16 = vlaneseq }
 0x92e   :  { %2085 = vmatpush3.bf16.msra.mxu0 %v2157_v41  ;;  %v2168_v41 = vld [vmem:[#allocation11 + $0x20] ss:$8 sps:$4 sm:$0xff]  }
 0x92f   :  { %2086 = vmatprep.subr.bf16.mxu0 %v2158_v29  ;;  %1524 = vmatpush1.bf16.msra.mxu1 %v2168_v41  ;;  %v1430_v41 = vshrl.u32 %v1429_v16, 7 }
 0x932   :  { %2087 = vmatpush3.bf16.msra.mxu0 %v2158_v29  ;;  %v2173_v29 = vld [vmem:[#allocation11 + $0x34] ss:$8 sps:$4 sm:$0xff]  }
 0x933   :  { %2088 = vmatprep.subr.bf16.mxu0 %v2159_v28  ;;  %1525 = vmatprep.subr.bf16.mxu1 %v2173_v29  ;;  %v1431_v29 = vsub.s32 0, %v1430_v41 }
 0x936   :  { %2089 = vmatpush3.bf16.msra.mxu0 %v2159_v28  ;;  %v2171_v28 = vld [vmem:[#allocation11 + $0x30] ss:$8 sps:$4 sm:$0xff]  }
 0x937   :  { %2090 = vmatprep.subr.bf16.mxu0 %v2160_v34  ;;  %1526 = vmatpush1.bf16.msra.mxu1 %v2171_v28  ;;  %v1427_v28 = vld [vmem:[%s2962_s10] sm:$0x3] }
 0x93a   :  { %2091 = vmatpush3.bf16.msra.mxu0 %v2160_v34  ;;  %v2179_v34 = vld [vmem:[#allocation11 + $0x54] ss:$8 sps:$4 sm:$0xff]  }
 0x93b   :  { %2092 = vmatprep.subr.bf16.mxu0 %v2161_v36 }
 0x93e   :  { %2093 = vmatpush3.bf16.msra.mxu0 %v2161_v36  ;;  %v2177_v36 = vld [vmem:[#allocation11 + $0x50] ss:$8 sps:$4 sm:$0xff]  }
 0x9ec   :  { %v2044_v30 = vpop.f32.mrb[12].mxu0 }
 0x9ed   :  { %v807_v32 = vpop.f32.mrb[13].mxu0 }
 0x9ee   :  { %v2045_v38 = vpop.f32.mrb[14].mxu0 }
 0x9ef   :  { %v823_v40 = vpack.c.bf16 %v2045_v38, %v2044_v30  ;;  %v810_v42 = vpop.f32.mrb[15].mxu0  ;;  %v2176_v30 = vld [vmem:[#allocation11 + $0x44] ss:$8 sps:$4 sm:$0xff]  }
 0x9f0   :  { %v822_v43 = vpack.c.bf16 %v810_v42, %v807_v32  ;;  %v2174_v32 = vld [vmem:[#allocation11 + $0x40] ss:$8 sps:$4 sm:$0xff]   ;;  %1527 = vmatprep.subr.bf16.mxu1 %v2176_v30  ;;  %v2182_v38 = vld [vmem:[#allocation11 + $0x64] ss:$8 sps:$4 sm:$0xff]   ;;  %v2185_v42 = vld [vmem:[#allocation11 + $0x74] ss:$8 sps:$4 sm:$0xff]  }
 0x9f1   :  { %828 = vrot.lane.b32.xlu1 %v823_v40, %s2480_s3  ;;  %1528 = vmatpush1.bf16.msra.mxu1 %v2174_v32  ;;  %v2180_v40 = vld [vmem:[#allocation11 + $0x60] ss:$8 sps:$4 sm:$0xff]   ;;  %v1435_v30 = vsub.s32 1, %v1430_v41  ;;  %v1432_v32 = vrot.slane %v1427_v28, %v1431_v29 }
 0x9f2   :  { %826 = vrot.lane.b32.xlu0 %v822_v43, %s2480_s3  ;;  %1529 = vmatprep.subr.bf16.mxu1 %v2179_v34  ;;  %v2183_v43 = vld [vmem:[#allocation11 + $0x70] ss:$8 sps:$4 sm:$0xff]  }
 0x9f3   :  { %v1436_v34 = vrot.slane %v1427_v28, %v1435_v30 }
 0x9f4   :  { %v2076_v44 = vpop.f32.mrb[16].mxu0 }
 0x9f5   :  { %1017 = vrot.lane.b32.xlu1 %v1012_v62, %s2470_s1  ;;  %v1185_v45 = vpop.f32.mrb[17].mxu0  ;;  %1530 = vmatpush1.bf16.msra.mxu1 %v2177_v36 }
 0x9f6   :  { %v2077_v46 = vpop.f32.mrb[18].mxu0  ;;  %1015 = vrot.lane.b32.xlu0 %v1011_v1, %s2470_s1  ;;  %1531 = vmatprep.subr.bf16.mxu1 %v2182_v38 }
 0x9f7   :  { %v1201_v47 = vpack.c.bf16 %v2077_v46, %v2076_v44  ;;  %v1188_v48 = vpop.f32.mrb[19].mxu0  ;;  %v2186_v44 = vld [vmem:[#allocation12 + $0x40] sm:$0xff]   ;;  %v2188_v46 = vld [vmem:[#allocation12 + $0x48] sm:$0xff]  }
 0x9f8   :  { %v1200_v49 = vpack.c.bf16 %v1188_v48, %v1185_v45  ;;  %v2187_v45 = vld [vmem:[#allocation12] sm:$0xff]   ;;  %1966 = vmatprep.subr.bf16.mxu0 %v2186_v44 }
 0x9f9   :  { %1206 = vrot.lane.b32.xlu1 %v1201_v47, %s2479_s2  ;;  %1532 = vmatpush1.bf16.msra.mxu1 %v2180_v40  ;;  %v2189_v47 = vld [vmem:[#allocation12 + $0x8] sm:$0xff]  }
 0x9fa   :  { %1204 = vrot.lane.b32.xlu0 %v1200_v49, %s2479_s2  ;;  %1533 = vmatprep.subr.bf16.mxu1 %v2185_v42 }
 0x9fd   :  { %1534 = vmatpush1.bf16.msra.mxu1 %v2183_v43 }
 0xa63   :  { %v829_v50 = vpop.permute.xlu1 %828 }
 0xa64   :  { %834 = vst.msk [vmem:[#allocation2 + $0x8] sm:$0xff] %vm832_vm1, %v829_v50  ;;  %v827_v51 = vpop.permute.xlu0 %826 }
 0xa65   :  { %833 = vst.msk [vmem:[#allocation2] sm:$0xff] %vm832_vm1, %v827_v51 }
 0xa67   :  { %v1018_v59 = vpop.permute.xlu1 %1017 }
 0xa68   :  { %1023 = vst.msk [vmem:[#allocation2 + $0x8] sm:$0xff] %vm1021_vm2, %v1018_v59  ;;  %v1016_v61 = vpop.permute.xlu0 %1015 }
 0xa69   :  { %1022 = vst.msk [vmem:[#allocation2] sm:$0xff] %vm1021_vm2, %v1016_v61 }
 0xa6b   :  { %v1207_v60 = vpop.permute.xlu1 %1206 }
 0xa6c   :  { %1212 = vst.msk [vmem:[#allocation2 + $0x8] sm:$0xff] %vm1210_vm3, %v1207_v60  ;;  %v1205_v62 = vpop.permute.xlu0 %1204 }
 0xa6d   :  { %1211 = vst.msk [vmem:[#allocation2] sm:$0xff] %vm1210_vm3, %v1205_v62 }
 0xa73   :  { %v1214_v1 = vld [vmem:[#allocation2 + $0x8] sm:$0xff] }
 0xa74   :  { %v1213_v63 = vld [vmem:[#allocation2] sm:$0xff] }
 0xa75   :  { %2094 = vmatprep.mubr.bf16.mxu0 %v1213_v63 }
 0xa76   :  { %2095 = vmatmul.mubr.bf16.vlgmr.msra.gmra.mrb[20].mxu0 %v1214_v1 }
 0xa77   :  { %1967 = vmatpush3.bf16.msra.mxu0 %v2187_v45 }
 0xa78   :  { %1968 = vmatprep.subr.bf16.mxu0 %v2188_v46 }
 0xa7b   :  { %1969 = vmatpush3.bf16.msra.mxu0 %v2189_v47 }
 0xb49   :  { %v2096_v52 = vpop.f32.mrb[20].mxu0 }
 0xb4a   :  { %v1313_v54 = vpop.f32.mrb[21].mxu0  ;;  %v1330_v2 = vadd.f32 %v2299_v0, %v2096_v52 }
 0xb4b   :  { %v1328_v56 = vadd.f32 %v2298_v55, %v1313_v54  ;;  %v2097_v57 = vpop.f32.mrb[22].mxu0  ;;  %v1879_v55 = vld [vmem:[%s2959_s7] ss:$0 sm:$0xff] }
 0xb4c   :  { %v1316_v58 = vpop.f32.mrb[23].mxu0  ;;  %v2889_v7 = vadd.f32 %v1878_v53, %v1330_v2  ;;  %v1331_v9 = vadd.f32 %v2301_v8, %v2097_v57 }
 0xb4d   :  { %v2884_v3 = vadd.f32 %v1878_v53, %v1328_v56  ;;  %v1329_v5 = vadd.f32 %v2300_v4, %v1316_v58  ;;  %v1880_v4 = vld [vmem:[%s2960_s8] ss:$0 sm:$0xff] }
 0xb4e   :  { %v2893_v10 = vadd.f32 %v1878_v53, %v1331_v9 }
 0xb4f   :  { %v2886_v6 = vadd.f32 %v1878_v53, %v1329_v5  ;;  %1345 = vadd.xlane.f32.xlu0 %v2884_v3 }
 0xb51   :  { %1347 = vadd.xlane.f32.xlu1 %v2886_v6 }
 0xb53   :  { %1349 = vadd.xlane.f32.xlu0 %v2889_v7 }
 0xb57   :  { %1351 = vadd.xlane.f32.xlu0 %v2893_v10 }
 0xbdc   :  { %v1346_v25 = vpop.xlane.xlu0 %1345 }
 0xbdd   :  { %v1353_v13 = vmul.f32 0.0078125, %v1346_v25 }
 0xbde   :  { %v1348_v15 = vpop.xlane.xlu1 %1347 }
 0xbdf   :  { %v2897_v17 = vsub.f32 %v2884_v3, %v1353_v13  ;;  %v1354_v19 = vmul.f32 0.0078125, %v1348_v15 }
 0xbe0   :  { %v1350_v20 = vpop.xlane.xlu0 %1349 }
 0xbe1   :  { %v2900_v21 = vsub.f32 %v2886_v6, %v1354_v19  ;;  %v1355_v22 = vmul.f32 0.0078125, %v1350_v20  ;;  %v1361_v24 = vmul.f32 %v2897_v17, %v2897_v17  ;;  %v2190_v20 = vld [vmem:[#allocation12 + $0x50] sm:$0xff]  }
 0xbe2   :  { %1970 = vmatprep.subr.bf16.mxu0 %v2190_v20 }
 0xbe3   :  { %v2905_v26 = vsub.f32 %v2889_v7, %v1355_v22  ;;  %1365 = vadd.xlane.f32.xlu0 %v1361_v24  ;;  %v1362_v18 = vmul.f32 %v2900_v21, %v2900_v21  ;;  %v2192_v22 = vld [vmem:[#allocation12 + $0x58] sm:$0xff]  }
 0xbe4   :  { %v1352_v33 = vpop.xlane.xlu0 %1351  ;;  %v2193_v24 = vld [vmem:[#allocation12 + $0x18] sm:$0xff]  }
 0xbe5   :  { %v1356_v27 = vmul.f32 0.0078125, %v1352_v33  ;;  %1367 = vadd.xlane.f32.xlu1 %v1362_v18  ;;  %v1363_v35 = vmul.f32 %v2905_v26, %v2905_v26  ;;  %v2195_v18 = vld [vmem:[#allocation12 + $0x20] sm:$0xff]   ;;  %v2196_v33 = vld [vmem:[#allocation12 + $0x68] sm:$0xff]  }
 0xbe7   :  { %v2912_v37 = vsub.f32 %v2893_v10, %v1356_v27  ;;  %1369 = vadd.xlane.f32.xlu0 %v1363_v35  ;;  %v2197_v27 = vld [vmem:[#allocation12 + $0x28] sm:$0xff]   ;;  %v2199_v35 = vld [vmem:[#allocation12 + $0x30] sm:$0xff]  }
 0xbe9   :  { %v1364_v31 = vmul.f32 %v2912_v37, %v2912_v37 }
 0xbeb   :  { %1371 = vadd.xlane.f32.xlu1 %v1364_v31  ;;  %v2201_v31 = vld [vmem:[#allocation12 + $0x38] sm:$0xff]  }
 0xc70   :  { %v1366_v48 = vpop.xlane.xlu0 %1365 }
 0xc71   :  { %v1373_v49 = vmul.f32 0.0078125, %v1366_v48 }
 0xc72   :  { %v1368_v50 = vpop.xlane.xlu1 %1367 }
 0xc73   :  { %v1377_v51 = vadd.f32 1e-05, %v1373_v49  ;;  %v1374_v59 = vmul.f32 0.0078125, %v1368_v50 }
 0xc74   :  { %v1370_v61 = vpop.xlane.xlu0 %1369 }
 0xc75   :  { %2274 = vrsqrt.f32 %v1377_v51  ;;  %v1378_v60 = vadd.f32 1e-05, %v1374_v59  ;;  %v1375_v62 = vmul.f32 0.0078125, %v1370_v61 }
 0xc77   :  { %2276 = vrsqrt.f32 %v1378_v60  ;;  %v1379_v63 = vadd.f32 1e-05, %v1375_v62 }
 0xc78   :  { %v1372_v1 = vpop.xlane.xlu1 %1371 }
 0xc79   :  { %2278 = vrsqrt.f32 %v1379_v63  ;;  %v1376_v52 = vmul.f32 0.0078125, %v1372_v1 }
 0xc7b   :  { %v1380_v53 = vadd.f32 1e-05, %v1376_v52 }
 0xc7d   :  { %2280 = vrsqrt.f32 %v1380_v53 }
 0xc7f   :  { %v2275_v54 = vpop.eup %2274 }
 0xc80   :  { %v1385_v56 = vmul.f32 %v2275_v54, %v2897_v17 }
 0xc81   :  { %v2277_v57 = vpop.eup %2276 }
 0xc82   :  { %v1386_v58 = vmul.f32 %v2277_v57, %v2900_v21  ;;  %v1395_v0 = vmul.f32 %v1879_v55, %v1385_v56  ;;  %v2191_v21 = vld [vmem:[#allocation12 + $0x10] sm:$0xff]  }
 0xc83   :  { %v2279_v2 = vpop.eup %2278  ;;  %1971 = vmatpush3.bf16.msra.mxu0 %v2191_v21 }
 0xc84   :  { %v1396_v5 = vmul.f32 %v1879_v55, %v1386_v58  ;;  %v1405_v8 = vadd.f32 %v1880_v4, %v1395_v0  ;;  %v1387_v11 = vmul.f32 %v2279_v2, %v2905_v26  ;;  %1972 = vmatprep.subr.bf16.mxu0 %v2192_v22  ;;  %v2194_v26 = vld [vmem:[#allocation12 + $0x60] sm:$0xff]  }
 0xc86   :  { %v1406_v9 = vadd.f32 %v1880_v4, %v1396_v5  ;;  %v1397_v25 = vmul.f32 %v1879_v55, %v1387_v11 }
 0xc87   :  { %v2281_v12 = vpop.eup %2280  ;;  %1973 = vmatpush3.bf16.msra.mxu0 %v2193_v24 }
 0xc88   :  { %v1409_v14 = vpack.c.bf16 %v1406_v9, %v1405_v8  ;;  %v1388_v23 = vmul.f32 %v2281_v12, %v2912_v37  ;;  %v1407_v17 = vadd.f32 %v1880_v4, %v1397_v25  ;;  %1974 = vmatprep.subr.bf16.mxu0 %v2194_v26  ;;  %v2200_v37 = vld [vmem:[#allocation12 + $0x78] sm:$0xff]  }
 0xc8a   :  { %1552 = vmatmul.mubr.bf16.vlgmr.msra.gmra.mrb[24].mxu1 %v1409_v14  ;;  %v1398_v13 = vmul.f32 %v1879_v55, %v1388_v23 }
 0xc8b   :  { %1561 = vmatprep.mubr.bf16.mxu1 %v2478_v39  ;;  %1975 = vmatpush3.bf16.msra.mxu0 %v2195_v18  ;;  %v2198_v39 = vld [vmem:[#allocation12 + $0x70] sm:$0xff]  }
 0xc8c   :  { %v1408_v15 = vadd.f32 %v1880_v4, %v1398_v13  ;;  %1976 = vmatprep.subr.bf16.mxu0 %v2196_v33 }
 0xc8e   :  { %v1410_v19 = vpack.c.bf16 %v1408_v15, %v1407_v17 }
 0xc8f   :  { %1977 = vmatpush3.bf16.msra.mxu0 %v2197_v27 }
 0xc90   :  { %1978 = vmatprep.subr.bf16.mxu0 %v2198_v39 }
 0xc92   :  { %1562 = vmatmul.mubr.bf16.gmra.mrb[28].mxu1 %v1410_v19 }
 0xc93   :  { %1979 = vmatpush3.bf16.msra.mxu0 %v2199_v35 }
 0xc94   :  { %1980 = vmatprep.subr.bf16.mxu0 %v2200_v37 }
 0xc97   :  { %1981 = vmatpush3.bf16.msra.mxu0 %v2201_v31 }
 0xd5d   :  { %v1553_v36 = vpop.f32.mrb[24].mxu1 }
 0xd5e   :  { %v1554_v38 = vadd.f32 %v1553_v36, %v1432_v32  ;;  %v1555_v40 = vpop.f32.mrb[25].mxu1 }
 0xd5f   :  { %v1556_v42 = vadd.f32 %v1555_v40, %v1436_v34  ;;  %v1557_v43 = vpop.f32.mrb[26].mxu1 }
 0xd60   :  { %v1580_v44 = vmul.f32 0.70710677, %v1554_v38  ;;  %v1558_v45 = vadd.f32 %v1557_v43, %v1432_v32  ;;  %v1559_v46 = vpop.f32.mrb[27].mxu1  ;;  %v1572_v8 = vmul.f32 0.5, %v1554_v38  ;;  %v1897_v38 = vld [vmem:[%s2964_s12] ss:$0 sm:$0xff] }
 0xd61   :  { %v1581_v47 = vmul.f32 0.70710677, %v1556_v42  ;;  %v1560_v48 = vadd.f32 %v1559_v46, %v1436_v34  ;;  %v1573_v12 = vmul.f32 0.5, %v1556_v42  ;;  %s2481_s12 = smov [#allocation14]  }
 0xd62   :  { %2282 = verf.f32 %v1580_v44  ;;  %v1582_v49 = vmul.f32 0.70710677, %v1558_v45  ;;  %v1574_v9 = vmul.f32 0.5, %v1558_v45  ;;  %s1813_s0 = sshll.u32 %s2481_s12, 4  ;;  %s1814_s0 = int_to_ptr.vmem [resolvable:$true] %s1813_s0 }
 0xd63   :  { %2284 = verf.f32 %v1581_v47  ;;  %v1583_v50 = vmul.f32 0.70710677, %v1560_v48  ;;  %v1575_v14 = vmul.f32 0.5, %v1560_v48  ;;  %s2434_s22 = scalar_lea.vmem %s1814_s0, 512  ;;  %p2439_p7 = scmp.lt.s32.totalorder %s1814_s0, %s1814_s0 }
 0xd64   :  { %2286 = verf.f32 %v1582_v49  ;;  %p2435_p6 = scmp.ne.s32.totalorder %s1814_s0, %s2434_s22  ;;  %p2440_p8 = scmp.lt.s32.totalorder %s2434_s22, %s2434_s22 }
 0xd65   :  { %2288 = verf.f32 %v1583_v50  ;;  %v1563_v51 = vpop.f32.mrb[28].mxu1 }
 0xd66   :  { %v1564_v59 = vadd.f32 %v1563_v51, %v1432_v32  ;;  %v1565_v61 = vpop.f32.mrb[29].mxu1  ;;  %p2441_p9 = por %p2440_p8, %p2439_p7 }
 0xd67   :  { %v1566_v60 = vadd.f32 %v1565_v61, %v1436_v34  ;;  %v1567_v62 = vpop.f32.mrb[30].mxu1 }
 0xd68   :  { %v1584_v63 = vmul.f32 0.70710677, %v1564_v59  ;;  %v1568_v1 = vadd.f32 %v1567_v62, %v1432_v32  ;;  %v1569_v52 = vpop.f32.mrb[31].mxu1  ;;  %v1576_v27 = vmul.f32 0.5, %v1564_v59  ;;  %p2442_p10 = pnand %p2441_p9, %p2435_p6 }
 0xd69   :  { %v1585_v53 = vmul.f32 0.70710677, %v1566_v60  ;;  %v1570_v54 = vadd.f32 %v1569_v52, %v1436_v34  ;;  %v1577_v37 = vmul.f32 0.5, %v1566_v60 }
 0xd6a   :  { %2290 = verf.f32 %v1584_v63  ;;  %v1586_v55 = vmul.f32 0.70710677, %v1568_v1  ;;  %v1578_v39 = vmul.f32 0.5, %v1568_v1 }
 0xd6b   :  { %2292 = verf.f32 %v1585_v53  ;;  %v1587_v56 = vmul.f32 0.70710677, %v1570_v54  ;;  %v1579_v31 = vmul.f32 0.5, %v1570_v54 }
 0xd6c   :  { %v2283_v57 = vpop.eup %2282  ;;  %2294 = verf.f32 %v1586_v55 }
 0xd6d   :  { %v2285_v58 = vpop.eup %2284  ;;  %v1596_v0 = vadd.f32 1.0, %v2283_v57  ;;  %2296 = verf.f32 %v1587_v56 }
 0xd6e   :  { %v2287_v2 = vpop.eup %2286  ;;  %v1597_v4 = vadd.f32 1.0, %v2285_v58 }
 0xd6f   :  { %v2289_v5 = vpop.eup %2288  ;;  %v1598_v11 = vadd.f32 1.0, %v2287_v2  ;;  %v1604_v25 = vmul.f32 %v1596_v0, %v1572_v8 }
 0xd70   :  { %v1599_v23 = vadd.f32 1.0, %v2289_v5  ;;  %v1605_v15 = vmul.f32 %v1597_v4, %v1573_v12 }
 0xd71   :  { %v1606_v13 = vmul.f32 %v1598_v11, %v1574_v9 }
 0xd72   :  { %v1607_v17 = vmul.f32 %v1599_v23, %v1575_v14 }
 0xd73   :  { %v1612_v19 = vpack.c.bf16 %v1606_v13, %v1604_v25 }
 0xd74   :  { %v2291_v20 = vpop.eup %2290  ;;  %v1613_v21 = vpack.c.bf16 %v1607_v17, %v1605_v15 }
 0xd75   :  { %v2293_v22 = vpop.eup %2292  ;;  %v1600_v24 = vadd.f32 1.0, %v2291_v20 }
 0xd76   :  { %v2295_v26 = vpop.eup %2294  ;;  %v1601_v18 = vadd.f32 1.0, %v2293_v22  ;;  %1783 = vmatprep.mubr.bf16.mxu0 %v1613_v21 }
 0xd77   :  { %v2297_v33 = vpop.eup %2296  ;;  %v1602_v35 = vadd.f32 1.0, %v2295_v26  ;;  %1784 = vmatmul.mubr.bf16.vlgmr.msra.gmra.mrb[24].mxu0 %v1612_v19  ;;  %v1608_v41 = vmul.f32 %v1600_v24, %v1576_v27 }
 0xd78   :  { %v1603_v16 = vadd.f32 1.0, %v2297_v33  ;;  %v1609_v28 = vmul.f32 %v1601_v18, %v1577_v37 }
 0xd79   :  { %v1610_v29 = vmul.f32 %v1602_v35, %v1578_v39 }
 0xd7a   :  { %v1611_v30 = vmul.f32 %v1603_v16, %v1579_v31 }
 0xd7b   :  { %v1614_v32 = vpack.c.bf16 %v1610_v29, %v1608_v41 }
 0xd7c   :  { %v1615_v34 = vpack.c.bf16 %v1611_v30, %v1609_v28 }
 0xd7e   :  { %1791 = vmatprep.mubr.bf16.mxu0 %v1615_v34 }
 0xd7f   :  { %1792 = vmatmul.mubr.bf16.gmra.mrb[28].mxu0 %v1614_v32 }
 0xe4a   :  { %v1982_v36 = vpop.f32.mrb[24].mxu0 }
 0xe4b   :  { %v1983_v40 = vpop.f32.mrb[25].mxu0 }
 0xe4c   :  { %v1984_v42 = vadd.f32 %v1983_v40, %v1982_v36  ;;  %v1985_v43 = vpop.f32.mrb[26].mxu0 }
 0xe4d   :  { %v1986_v44 = vpop.f32.mrb[27].mxu0 }
 0xe4e   :  { %v1786_v45 = vadd.f32 %v1984_v42, %v1897_v38  ;;  %v1987_v46 = vadd.f32 %v1986_v44, %v1985_v43 }
 0xe50   :  { %v1800_v47 = vadd.f32 %v1786_v45, %v2884_v3  ;;  %v1789_v48 = vadd.f32 %v1987_v46, %v1897_v38 }
 0xe52   :  { %1804 = vst [vmem:[#allocation14] sm:$0xff] %v1800_v47  ;;  %v1801_v49 = vadd.f32 %v1789_v48, %v2886_v6  ;;  %v1988_v50 = vpop.f32.mrb[28].mxu0 }
 0xe53   :  { %v1989_v51 = vpop.f32.mrb[29].mxu0 }
 0xe54   :  { %1805 = vst [vmem:[#allocation14 + $0x8] sm:$0xff] %v1801_v49  ;;  %v1990_v59 = vadd.f32 %v1989_v51, %v1988_v50  ;;  %v1991_v61 = vpop.f32.mrb[30].mxu0 }
 0xe55   :  { %v1992_v60 = vpop.f32.mrb[31].mxu0 }
 0xe56   :  { %v1794_v62 = vadd.f32 %v1990_v59, %v1897_v38  ;;  %v1993_v63 = vadd.f32 %v1992_v60, %v1991_v61 }
 0xe58   :  { %v1802_v1 = vadd.f32 %v1794_v62, %v2889_v7  ;;  %v1797_v52 = vadd.f32 %v1993_v63, %v1897_v38 }
 0xe5a   :  { %1806 = vst [vmem:[#allocation14 + $0x10] sm:$0xff] %v1802_v1  ;;  %v1803_v3 = vadd.f32 %v1797_v52, %v2893_v10 }
 0xe5c   :  { %1807 = vst [vmem:[#allocation14 + $0x18] sm:$0xff] %v1803_v3 }
 0xe5d   :  { %2445 = shalt.err (!%p2442_p10)
}
 0xe5e   :  { %s2446_s5 = scalar_lea.hbm %s2965_s13, 512 }
 0xe5f   :  { %p2447_p11 = scmp.ne.s32.totalorder %s2965_s13, %s2446_s5  ;;  %p2450_p12 = scmp.lt.u32.totalorder %s2446_s5, %s2965_s13 }
 0xe61   :  { %p2452_p13 = pnand %p2450_p12, %p2447_p11 }
 0xe63   :  { %2455 = shalt.err (!%p2452_p13)
}
 0xe64   :  { %1819 = dma.vmem_to_hbm [thread:$0]  %s1814_s0, 512, %s2965_s13, [#allocation5], %s2468_s20, %s2468_s20, %s2469_s21  }
 0xe65   :  { %2464 = dma.done.wait [#allocation5], 512  }
 0xe66   :  { %2465 = vsyncadd [#allocation5], 4294966784 }
 0xe67   :  { %1823 = vsyncpa [#allocation4], 1 }
 0xe68   :  { %1824 = vsyncpa [#allocation7], 1 }
 0xe69   :  { %1825 = vsyncpa [#allocation10], 1 }
 0xe6a   :  { %1826 = vsyncpa [#allocation13], 1 }
 0xe6b   :  { %1827 = vsyncpa [#allocation5], 1 }

</bundles_post_ra>
